<compile_context>
chip_gen: v7x
topology: tpu7x:2x2x1
jax: 0.10.0
libtpu: 0.0.40
codegen_flags: <defaults>
</compile_context>

<pallas_src>
import math

import jax
import jax.numpy as jnp
import numpy as np
from jax.experimental import pallas as pl

# ----------------------------------------------------------------------------
# Synthetic small config: a 16-layer "model"; Part2 owns layers 14..15
# (2 layers), the final norm and the lm_head.
# ----------------------------------------------------------------------------
B, S, D = 2, 8, 32          # batch, seqlen, hidden
NUM_HEADS = 4
HEAD_DIM = D // NUM_HEADS   # 8
INTER = 64                  # MLP intermediate size
VOCAB = 128
N_PART2_LAYERS = 2          # layers[14:] of a 16-layer model
EPS = 1e-6
ROPE_THETA = 10000.0
T = B * S                   # flattened token count


# ----------------------------------------------------------------------------
# In-kernel helper (traced inside the Pallas kernel).
# ----------------------------------------------------------------------------
def _rmsnorm(x, w):
    var = jnp.mean(x * x, axis=-1, keepdims=True)
    return x * jax.lax.rsqrt(var + EPS) * w


# ----------------------------------------------------------------------------
# The fused Pallas kernel: N decoder layers + final RMSNorm + lm_head.
#
# Refs (all whole arrays resident in VMEM, no grid):
#   hid    [T, D]  f32
#   cosq/sinq/cosk/sink [T, H*hd]=[T, D] f32  (q-side tables pre-scaled by 1/sqrt(hd))
#   mask   [T, T]  f32   block-diagonal causal mask (batch isolation + causality)
#   ln1    [L, 1, D] f32
#   wqkv   [L, D, 5*D] bf16   columns = [Wq | rot(Wq) | Wk | rot(Wk) | Wv]
#   wo     [L, D, D]   bf16
#   ln2    [L, 1, D] f32
#   wgu    [L, D, 2*I] bf16   columns = [Wgate | Wup]
#   wd     [L, I, D]   bf16
#   normw  [1, D] f32,  wlm [D, VOCAB] bf16
#   out    [T, VOCAB] f32
# ----------------------------------------------------------------------------
def part2_fused_kernel(hid_ref, cosq_ref, sinq_ref, cosk_ref, sink_ref, mask_ref,
                       ln1_ref, wqkv_ref, wo_ref, ln2_ref, wgu_ref, wd_ref,
                       normw_ref, wlm_ref, out_ref):
    x = hid_ref[...]                       # [T, D] f32 residual stream, resident
    cosq = cosq_ref[...]                   # loads hoisted out of the layer loop
    sinq = sinq_ref[...]
    cosk = cosk_ref[...]
    sink = sink_ref[...]
    mask = mask_ref[...]                   # [T, T]

    for l in range(N_PART2_LAYERS):        # static unroll over layers
        # ---- self attention -------------------------------------------------
        h = _rmsnorm(x, ln1_ref[l]).astype(jnp.bfloat16)      # single bf16 cast
        # One lane-dense projection matmul for Q, rot(Q), K, rot(K), V.
        qkv = jnp.dot(h, wqkv_ref[l], preferred_element_type=jnp.float32)  # [T,5D]
        # RoPE fully fused via pre-rotated weight copies (heads packed in lanes).
        q = qkv[:, 0 * D:1 * D] * cosq + qkv[:, 1 * D:2 * D] * sinq   # scaled by 1/sqrt(hd)
        k = qkv[:, 2 * D:3 * D] * cosk + qkv[:, 3 * D:4 * D] * sink
        v = qkv[:, 4 * D:5 * D]
        qb = q.astype(jnp.bfloat16)
        kb = k.astype(jnp.bfloat16)
        vb = v.astype(jnp.bfloat16)

        # Per-head attention on [T, hd] with a block-diagonal [T, T] mask
        # (no per-(head,batch) stacks / concats, no batched sub-vreg einsums).
        o_heads = []
        for hh in range(NUM_HEADS):
            cs = slice(hh * HEAD_DIM, (hh + 1) * HEAD_DIM)
            s = jnp.einsum("qd,kd->qk", qb[:, cs], kb[:, cs],
                           preferred_element_type=jnp.float32)         # [T, T]
            s = s + mask
            s = s - jnp.max(s, axis=-1, keepdims=True)
            p = jnp.exp(s)
            p = p * pl.reciprocal(jnp.sum(p, axis=-1, keepdims=True), approx=True)
            o_heads.append(jnp.dot(p.astype(jnp.bfloat16), vb[:, cs],
                                   preferred_element_type=jnp.float32))  # [T, hd]
        o_cat = jnp.concatenate(o_heads, axis=-1).astype(jnp.bfloat16)   # [T, D]
        # Single O projection at full contraction depth D.
        x = x + jnp.dot(o_cat, wo_ref[l], preferred_element_type=jnp.float32)

        # ---- SwiGLU MLP (gate/up merged into one lane-dense matmul) ----------
        h2 = _rmsnorm(x, ln2_ref[l]).astype(jnp.bfloat16)
        gu = jnp.dot(h2, wgu_ref[l], preferred_element_type=jnp.float32)  # [T, 2I]
        g = gu[:, :INTER]
        u = gu[:, INTER:]
        act = (g * jax.nn.sigmoid(g) * u).astype(jnp.bfloat16)
        x = x + jnp.dot(act, wd_ref[l], preferred_element_type=jnp.float32)

    # ---- final RMSNorm + lm_head (only store = lane-dense VOCAB=128) --------
    xf = _rmsnorm(x, normw_ref[...]).astype(jnp.bfloat16)
    out_ref[...] = jnp.dot(xf, wlm_ref[...], preferred_element_type=jnp.float32)


# ----------------------------------------------------------------------------
# Host-side glue: rotary tables, masks, weight preparation, wrapper.
# ----------------------------------------------------------------------------
def rotary_tables(seqlen):
    inv_freq = 1.0 / (ROPE_THETA ** (np.arange(0, HEAD_DIM, 2, dtype=np.float32)
                                     / HEAD_DIM))
    pos = np.arange(seqlen, dtype=np.float32)
    freqs = np.outer(pos, inv_freq)                       # [S, hd//2]
    emb = np.concatenate([freqs, freqs], axis=-1)         # [S, hd]
    return jnp.asarray(np.cos(emb)), jnp.asarray(np.sin(emb))


def build_causal_mask(seqlen):
    # Reference-side per-batch causal mask (-1e9 == -inf after softmax).
    m = np.triu(np.full((seqlen, seqlen), -1e9, dtype=np.float32), k=1)
    return jnp.asarray(m)


def build_block_causal_mask(bsz, seqlen):
    # [T, T] additive mask: allowed iff same batch element AND key pos <= query pos.
    idx = np.arange(bsz * seqlen)
    bi, si = idx // seqlen, idx % seqlen
    allowed = (bi[:, None] == bi[None, :]) & (si[:, None] >= si[None, :])
    return jnp.asarray(np.where(allowed, 0.0, -1e9).astype(np.float32))


def _rotate_half_cols(w):
    # rotate_half applied per head to the OUTPUT columns of a [D, H*hd] weight:
    # h @ rotate_half_cols(W) == rotate_half(h @ W)  (exact signed column permute).
    wh = w.reshape(D, NUM_HEADS, HEAD_DIM)
    half = HEAD_DIM // 2
    whr = jnp.concatenate([-wh[..., half:], wh[..., :half]], axis=-1)
    return whr.reshape(D, NUM_HEADS * HEAD_DIM)


def prepare_kernel_params(params):
    ln1s, ln2s, wqkvs, wos, wgus, wds = [], [], [], [], [], []
    for (ln1, wq, wk, wv, wo, ln2, wg, wu, wd) in params["layers"]:
        wqkv = jnp.concatenate(
            [wq, _rotate_half_cols(wq), wk, _rotate_half_cols(wk), wv], axis=-1)
        ln1s.append(ln1)
        ln2s.append(ln2)
        wqkvs.append(wqkv.astype(jnp.bfloat16))          # [D, 5*D]
        wos.append(wo.astype(jnp.bfloat16))              # [D, D] (head-packed rows)
        wgus.append(jnp.concatenate([wg, wu], axis=-1).astype(jnp.bfloat16))  # [D, 2I]
        wds.append(wd.astype(jnp.bfloat16))              # [I, D]
    return {
        "ln1": jnp.stack(ln1s), "ln2": jnp.stack(ln2s),
        "wqkv": jnp.stack(wqkvs), "wo": jnp.stack(wos),
        "wgu": jnp.stack(wgus), "wd": jnp.stack(wds),
    }


def part2_forward(hidden, attention_mask, params):
    bsz, seqlen, dmodel = hidden.shape
    cos, sin = rotary_tables(seqlen)                      # [S, hd]
    # `attention_mask.dim() == 2` branch of the PyTorch module: the 2-D mask is
    # replaced wholesale by a causal triu(-inf) mask.  Here batch isolation and
    # causality are folded into one [T, T] block-diagonal additive mask.
    assert attention_mask.ndim == 2
    assert attention_mask.shape[-1] == seqlen
    mask_tt = build_block_causal_mask(bsz, seqlen)

    scale = 1.0 / math.sqrt(HEAD_DIM)
    cos_t = jnp.tile(cos, (bsz, NUM_HEADS))               # [T, H*hd] = [T, D]
    sin_t = jnp.tile(sin, (bsz, NUM_HEADS))
    cosq, sinq = cos_t * scale, sin_t * scale             # fold 1/sqrt(hd) into q side

    kp = prepare_kernel_params(params)
    hid2d = hidden.reshape(bsz * seqlen, dmodel)          # [T, D]

    logits2d = pl.pallas_call(
        part2_fused_kernel,
        out_shape=jax.ShapeDtypeStruct((bsz * seqlen, VOCAB), jnp.float32),
    )(hid2d, cosq, sinq, cos_t, sin_t, mask_tt,
      kp["ln1"], kp["wqkv"], kp["wo"], kp["ln2"], kp["wgu"], kp["wd"],
      params["norm"], params["lm_head"].astype(jnp.bfloat16))
    return logits2d.reshape(bsz, seqlen, VOCAB)


# ----------------------------------------------------------------------------
# Deterministic synthetic parameters (same layout as the reference version).
# ----------------------------------------------------------------------------
def init_params(key):
    def dense(k, shape):
        return 0.02 * jax.random.normal(k, shape, dtype=jnp.float32)

    layers = []
    for _ in range(N_PART2_LAYERS):
        key, *ks = jax.random.split(key, 8)
        ln1 = jnp.ones((1, D), jnp.float32)
        ln2 = jnp.ones((1, D), jnp.float32)
        wq = dense(ks[0], (D, D))
        wk = dense(ks[1], (D, D))
        wv = dense(ks[2], (D, D))
        wo = dense(ks[3], (D, D))
        wg = dense(ks[4], (D, INTER))
        wu = dense(ks[5], (D, INTER))
        wd = dense(ks[6], (INTER, D))
        layers.append((ln1, wq, wk, wv, wo, ln2, wg, wu, wd))
    key, k_lm = jax.random.split(key)
    return {
        "layers": layers,
        "norm": jnp.ones((1, D), jnp.float32),
        "lm_head": dense(k_lm, (D, VOCAB)),
    }


# ----------------------------------------------------------------------------
# Pure-JAX f32 reference (same math) for a correctness check.
# ----------------------------------------------------------------------------
def ref_forward(hidden, attention_mask, params):
    cos, sin = rotary_tables(hidden.shape[1])
    mask = build_causal_mask(attention_mask.shape[-1])

    def rms(x, w):
        return x * jax.lax.rsqrt(jnp.mean(x * x, -1, keepdims=True) + EPS) * w

    def rot_half(x):
        h = x.shape[-1] // 2
        return jnp.concatenate([-x[..., h:], x[..., :h]], -1)

    x = hidden
    for (ln1, wq, wk, wv, wo, ln2, wg, wu, wd) in params["layers"]:
        h = rms(x, ln1)
        q = (h @ wq).reshape(B, S, NUM_HEADS, HEAD_DIM).transpose(0, 2, 1, 3)
        k = (h @ wk).reshape(B, S, NUM_HEADS, HEAD_DIM).transpose(0, 2, 1, 3)
        v = (h @ wv).reshape(B, S, NUM_HEADS, HEAD_DIM).transpose(0, 2, 1, 3)
        q = q * cos[None, None] + rot_half(q) * sin[None, None]
        k = k * cos[None, None] + rot_half(k) * sin[None, None]
        s = jnp.einsum("bhqd,bhkd->bhqk", q, k) / math.sqrt(HEAD_DIM) + mask
        p = jax.nn.softmax(s, axis=-1)
        o = jnp.einsum("bhqk,bhkd->bhqd", p, v).transpose(0, 2, 1, 3)
        o = o.reshape(B, S, D)
        x = x + o @ wo
        h2 = rms(x, ln2)
        x = x + (jax.nn.silu(h2 @ wg) * (h2 @ wu)) @ wd
    return rms(x, params["norm"]) @ params["lm_head"]


# TODO(synk): torch.distributed / pipelining-schedule imports in the source file
# are pipeline-orchestration glue with no kernel equivalent; only forward() is
# implemented here.

if __name__ == "__main__":
    key = jax.random.PRNGKey(0)
    k_params, k_hidden = jax.random.split(key)
    params = init_params(k_params)

    hidden = jax.random.normal(k_hidden, (B, S, D), dtype=jnp.float32)
    attention_mask = jnp.ones((B, S), dtype=jnp.float32)   # 2-D mask path

    logits = part2_forward(hidden, attention_mask, params)
    logits = jax.block_until_ready(logits)

    assert logits.shape == (B, S, VOCAB)
    assert bool(jnp.all(jnp.isfinite(logits)))

    with jax.default_matmul_precision("highest"):           # true f32 reference
        ref = jax.block_until_ready(ref_forward(hidden, attention_mask, params))

    # Kernel uses bf16 MXU operands (weights pre-cast host-side) with f32
    # accumulation and an approx-reciprocal softmax denominator; allow
    # bf16-level slack vs the f32 'highest' reference.
    np.testing.assert_allclose(np.asarray(logits), np.asarray(ref),
                               rtol=2e-2, atol=5e-3)
    print("KERNEL_OK")
</pallas_src>

<mosaic_0001>
module attributes {stable_mosaic.version = 11 : i64} {
  func.func @part2_fused_kernel(%arg0: memref<16x32xf32, #tpu.memory_space<vmem>>, %arg1: memref<16x32xf32, #tpu.memory_space<vmem>>, %arg2: memref<16x32xf32, #tpu.memory_space<vmem>>, %arg3: memref<16x32xf32, #tpu.memory_space<vmem>>, %arg4: memref<16x32xf32, #tpu.memory_space<vmem>>, %arg5: memref<16x16xf32, #tpu.memory_space<vmem>>, %arg6: memref<2x1x32xf32, #tpu.memory_space<vmem>>, %arg7: memref<2x32x160xbf16, #tpu.memory_space<vmem>>, %arg8: memref<2x32x32xbf16, #tpu.memory_space<vmem>>, %arg9: memref<2x1x32xf32, #tpu.memory_space<vmem>>, %arg10: memref<2x32x128xbf16, #tpu.memory_space<vmem>>, %arg11: memref<2x64x32xbf16, #tpu.memory_space<vmem>>, %arg12: memref<1x32xf32, #tpu.memory_space<vmem>>, %arg13: memref<32x128xbf16, #tpu.memory_space<vmem>>, %arg14: memref<16x128xf32, #tpu.memory_space<vmem>>) attributes {dimension_semantics = [], scalar_prefetch = 0 : i64, scratch_operands = 0 : i64, tpu.core_type = #tpu.core_type<tc>} {
    %c0 = arith.constant 0 : index
    %c0_0 = arith.constant 0 : index
    %0 = vector.load %arg0[%c0, %c0_0] : memref<16x32xf32, #tpu.memory_space<vmem>>, vector<16x32xf32>
    %c0_1 = arith.constant 0 : index
    %c0_2 = arith.constant 0 : index
    %1 = vector.load %arg1[%c0_1, %c0_2] : memref<16x32xf32, #tpu.memory_space<vmem>>, vector<16x32xf32>
    %c0_3 = arith.constant 0 : index
    %c0_4 = arith.constant 0 : index
    %2 = vector.load %arg2[%c0_3, %c0_4] : memref<16x32xf32, #tpu.memory_space<vmem>>, vector<16x32xf32>
    %c0_5 = arith.constant 0 : index
    %c0_6 = arith.constant 0 : index
    %3 = vector.load %arg3[%c0_5, %c0_6] : memref<16x32xf32, #tpu.memory_space<vmem>>, vector<16x32xf32>
    %c0_7 = arith.constant 0 : index
    %c0_8 = arith.constant 0 : index
    %4 = vector.load %arg4[%c0_7, %c0_8] : memref<16x32xf32, #tpu.memory_space<vmem>>, vector<16x32xf32>
    %c0_9 = arith.constant 0 : index
    %c0_10 = arith.constant 0 : index
    %5 = vector.load %arg5[%c0_9, %c0_10] : memref<16x16xf32, #tpu.memory_space<vmem>>, vector<16x16xf32>
    %c0_11 = arith.constant 0 : index
    %c0_12 = arith.constant 0 : index
    %c0_13 = arith.constant 0 : index
    %6 = vector.load %arg6[%c0_11, %c0_12, %c0_13] : memref<2x1x32xf32, #tpu.memory_space<vmem>>, vector<1x1x32xf32>
    %7 = vector.shape_cast %6 : vector<1x1x32xf32> to vector<1x32xf32>
    %8 = arith.mulf %0, %0 : vector<16x32xf32>
    %cst = arith.constant dense<0.000000e+00> : vector<16xf32>
    %9 = vector.multi_reduction <add>, %8, %cst [1] : vector<16x32xf32> to vector<16xf32>
    %10 = vector.shape_cast %9 : vector<16xf32> to vector<16x1xf32>
    %cst_14 = arith.constant 3.200000e+01 : f32
    %11 = vector.broadcast %cst_14 : f32 to vector<16x1xf32>
    %12 = arith.divf %10, %11 : vector<16x1xf32>
    %cst_15 = arith.constant 9.99999997E-7 : f32
    %13 = vector.broadcast %cst_15 : f32 to vector<16x1xf32>
    %14 = arith.addf %12, %13 : vector<16x1xf32>
    %15 = math.rsqrt %14 : vector<16x1xf32>
    %16 = vector.broadcast %15 : vector<16x1xf32> to vector<16x32xf32>
    %17 = arith.mulf %0, %16 : vector<16x32xf32>
    %18 = vector.broadcast %7 : vector<1x32xf32> to vector<16x32xf32>
    %19 = arith.mulf %17, %18 : vector<16x32xf32>
    %20 = arith.truncf %19 : vector<16x32xf32> to vector<16x32xbf16>
    %c0_16 = arith.constant 0 : index
    %c0_17 = arith.constant 0 : index
    %c0_18 = arith.constant 0 : index
    %21 = vector.load %arg7[%c0_16, %c0_17, %c0_18] : memref<2x32x160xbf16, #tpu.memory_space<vmem>>, vector<1x32x160xbf16>
    %22 = vector.shape_cast %21 : vector<1x32x160xbf16> to vector<32x160xbf16>
    %cst_19 = arith.constant dense<0.000000e+00> : vector<16x160xf32>
    %23 = tpu.matmul %20, %22, %cst_19 {dimension_numbers = #tpu.dot_dimension_numbers<[1], [0], [0], [1], [0, 0, 1, 1], [], []>} : vector<16x32xbf16>, vector<32x160xbf16>, vector<16x160xf32> -> vector<16x160xf32>
    %24 = vector.extract_strided_slice %23 {offsets = [0, 0], sizes = [16, 32], strides = [1, 1]} : vector<16x160xf32> to vector<16x32xf32>
    %25 = arith.mulf %24, %1 : vector<16x32xf32>
    %26 = vector.extract_strided_slice %23 {offsets = [0, 32], sizes = [16, 32], strides = [1, 1]} : vector<16x160xf32> to vector<16x32xf32>
    %27 = arith.mulf %26, %2 : vector<16x32xf32>
    %28 = arith.addf %25, %27 : vector<16x32xf32>
    %29 = vector.extract_strided_slice %23 {offsets = [0, 64], sizes = [16, 32], strides = [1, 1]} : vector<16x160xf32> to vector<16x32xf32>
    %30 = arith.mulf %29, %3 : vector<16x32xf32>
    %31 = vector.extract_strided_slice %23 {offsets = [0, 96], sizes = [16, 32], strides = [1, 1]} : vector<16x160xf32> to vector<16x32xf32>
    %32 = arith.mulf %31, %4 : vector<16x32xf32>
    %33 = arith.addf %30, %32 : vector<16x32xf32>
    %34 = vector.extract_strided_slice %23 {offsets = [0, 128], sizes = [16, 32], strides = [1, 1]} : vector<16x160xf32> to vector<16x32xf32>
    %35 = arith.truncf %28 : vector<16x32xf32> to vector<16x32xbf16>
    %36 = arith.truncf %33 : vector<16x32xf32> to vector<16x32xbf16>
    %37 = arith.truncf %34 : vector<16x32xf32> to vector<16x32xbf16>
    %38 = vector.extract_strided_slice %35 {offsets = [0, 0], sizes = [16, 8], strides = [1, 1]} : vector<16x32xbf16> to vector<16x8xbf16>
    %39 = vector.extract_strided_slice %36 {offsets = [0, 0], sizes = [16, 8], strides = [1, 1]} : vector<16x32xbf16> to vector<16x8xbf16>
    "tpu.trace_start"() <{level = 10 : i32, message = "qd,kd->qk"}> : () -> ()
    %cst_20 = arith.constant dense<0.000000e+00> : vector<16x16xf32>
    %40 = tpu.matmul %38, %39, %cst_20 {dimension_numbers = #tpu.dot_dimension_numbers<[1], [1], [0], [0], [0, 0, 1, 0], [], []>} : vector<16x8xbf16>, vector<16x8xbf16>, vector<16x16xf32> -> vector<16x16xf32>
    "tpu.trace_stop"() : () -> ()
    %41 = arith.addf %40, %5 : vector<16x16xf32>
    %cst_21 = arith.constant dense<0xFF800000> : vector<16xf32>
    %42 = vector.multi_reduction <maximumf>, %41, %cst_21 [1] : vector<16x16xf32> to vector<16xf32>
    %43 = vector.shape_cast %42 : vector<16xf32> to vector<16x1xf32>
    %44 = vector.broadcast %43 : vector<16x1xf32> to vector<16x16xf32>
    %45 = arith.subf %41, %44 : vector<16x16xf32>
    %46 = math.exp %45 : vector<16x16xf32>
    %cst_22 = arith.constant dense<0.000000e+00> : vector<16xf32>
    %47 = vector.multi_reduction <add>, %46, %cst_22 [1] : vector<16x16xf32> to vector<16xf32>
    %48 = vector.shape_cast %47 : vector<16xf32> to vector<16x1xf32>
    %49 = tpu.reciprocal %48 {approx = true} : vector<16x1xf32> -> vector<16x1xf32>
    %50 = vector.broadcast %49 : vector<16x1xf32> to vector<16x16xf32>
    %51 = arith.mulf %46, %50 : vector<16x16xf32>
    %52 = arith.truncf %51 : vector<16x16xf32> to vector<16x16xbf16>
    %53 = vector.extract_strided_slice %37 {offsets = [0, 0], sizes = [16, 8], strides = [1, 1]} : vector<16x32xbf16> to vector<16x8xbf16>
    %cst_23 = arith.constant dense<0.000000e+00> : vector<16x8xf32>
    %54 = tpu.matmul %52, %53, %cst_23 {dimension_numbers = #tpu.dot_dimension_numbers<[1], [0], [0], [1], [0, 0, 1, 1], [], []>} : vector<16x16xbf16>, vector<16x8xbf16>, vector<16x8xf32> -> vector<16x8xf32>
    %55 = vector.extract_strided_slice %35 {offsets = [0, 8], sizes = [16, 8], strides = [1, 1]} : vector<16x32xbf16> to vector<16x8xbf16>
    %56 = vector.extract_strided_slice %36 {offsets = [0, 8], sizes = [16, 8], strides = [1, 1]} : vector<16x32xbf16> to vector<16x8xbf16>
    "tpu.trace_start"() <{level = 10 : i32, message = "qd,kd->qk"}> : () -> ()
    %cst_24 = arith.constant dense<0.000000e+00> : vector<16x16xf32>
    %57 = tpu.matmul %55, %56, %cst_24 {dimension_numbers = #tpu.dot_dimension_numbers<[1], [1], [0], [0], [0, 0, 1, 0], [], []>} : vector<16x8xbf16>, vector<16x8xbf16>, vector<16x16xf32> -> vector<16x16xf32>
    "tpu.trace_stop"() : () -> ()
    %58 = arith.addf %57, %5 : vector<16x16xf32>
    %cst_25 = arith.constant dense<0xFF800000> : vector<16xf32>
    %59 = vector.multi_reduction <maximumf>, %58, %cst_25 [1] : vector<16x16xf32> to vector<16xf32>
    %60 = vector.shape_cast %59 : vector<16xf32> to vector<16x1xf32>
    %61 = vector.broadcast %60 : vector<16x1xf32> to vector<16x16xf32>
    %62 = arith.subf %58, %61 : vector<16x16xf32>
    %63 = math.exp %62 : vector<16x16xf32>
    %cst_26 = arith.constant dense<0.000000e+00> : vector<16xf32>
    %64 = vector.multi_reduction <add>, %63, %cst_26 [1] : vector<16x16xf32> to vector<16xf32>
    %65 = vector.shape_cast %64 : vector<16xf32> to vector<16x1xf32>
    %66 = tpu.reciprocal %65 {approx = true} : vector<16x1xf32> -> vector<16x1xf32>
    %67 = vector.broadcast %66 : vector<16x1xf32> to vector<16x16xf32>
    %68 = arith.mulf %63, %67 : vector<16x16xf32>
    %69 = arith.truncf %68 : vector<16x16xf32> to vector<16x16xbf16>
    %70 = vector.extract_strided_slice %37 {offsets = [0, 8], sizes = [16, 8], strides = [1, 1]} : vector<16x32xbf16> to vector<16x8xbf16>
    %cst_27 = arith.constant dense<0.000000e+00> : vector<16x8xf32>
    %71 = tpu.matmul %69, %70, %cst_27 {dimension_numbers = #tpu.dot_dimension_numbers<[1], [0], [0], [1], [0, 0, 1, 1], [], []>} : vector<16x16xbf16>, vector<16x8xbf16>, vector<16x8xf32> -> vector<16x8xf32>
    %72 = vector.extract_strided_slice %35 {offsets = [0, 16], sizes = [16, 8], strides = [1, 1]} : vector<16x32xbf16> to vector<16x8xbf16>
    %73 = vector.extract_strided_slice %36 {offsets = [0, 16], sizes = [16, 8], strides = [1, 1]} : vector<16x32xbf16> to vector<16x8xbf16>
    "tpu.trace_start"() <{level = 10 : i32, message = "qd,kd->qk"}> : () -> ()
    %cst_28 = arith.constant dense<0.000000e+00> : vector<16x16xf32>
    %74 = tpu.matmul %72, %73, %cst_28 {dimension_numbers = #tpu.dot_dimension_numbers<[1], [1], [0], [0], [0, 0, 1, 0], [], []>} : vector<16x8xbf16>, vector<16x8xbf16>, vector<16x16xf32> -> vector<16x16xf32>
    "tpu.trace_stop"() : () -> ()
    %75 = arith.addf %74, %5 : vector<16x16xf32>
    %cst_29 = arith.constant dense<0xFF800000> : vector<16xf32>
    %76 = vector.multi_reduction <maximumf>, %75, %cst_29 [1] : vector<16x16xf32> to vector<16xf32>
    %77 = vector.shape_cast %76 : vector<16xf32> to vector<16x1xf32>
    %78 = vector.broadcast %77 : vector<16x1xf32> to vector<16x16xf32>
    %79 = arith.subf %75, %78 : vector<16x16xf32>
    %80 = math.exp %79 : vector<16x16xf32>
    %cst_30 = arith.constant dense<0.000000e+00> : vector<16xf32>
    %81 = vector.multi_reduction <add>, %80, %cst_30 [1] : vector<16x16xf32> to vector<16xf32>
    %82 = vector.shape_cast %81 : vector<16xf32> to vector<16x1xf32>
    %83 = tpu.reciprocal %82 {approx = true} : vector<16x1xf32> -> vector<16x1xf32>
    %84 = vector.broadcast %83 : vector<16x1xf32> to vector<16x16xf32>
    %85 = arith.mulf %80, %84 : vector<16x16xf32>
    %86 = arith.truncf %85 : vector<16x16xf32> to vector<16x16xbf16>
    %87 = vector.extract_strided_slice %37 {offsets = [0, 16], sizes = [16, 8], strides = [1, 1]} : vector<16x32xbf16> to vector<16x8xbf16>
    %cst_31 = arith.constant dense<0.000000e+00> : vector<16x8xf32>
    %88 = tpu.matmul %86, %87, %cst_31 {dimension_numbers = #tpu.dot_dimension_numbers<[1], [0], [0], [1], [0, 0, 1, 1], [], []>} : vector<16x16xbf16>, vector<16x8xbf16>, vector<16x8xf32> -> vector<16x8xf32>
    %89 = vector.extract_strided_slice %35 {offsets = [0, 24], sizes = [16, 8], strides = [1, 1]} : vector<16x32xbf16> to vector<16x8xbf16>
    %90 = vector.extract_strided_slice %36 {offsets = [0, 24], sizes = [16, 8], strides = [1, 1]} : vector<16x32xbf16> to vector<16x8xbf16>
    "tpu.trace_start"() <{level = 10 : i32, message = "qd,kd->qk"}> : () -> ()
    %cst_32 = arith.constant dense<0.000000e+00> : vector<16x16xf32>
    %91 = tpu.matmul %89, %90, %cst_32 {dimension_numbers = #tpu.dot_dimension_numbers<[1], [1], [0], [0], [0, 0, 1, 0], [], []>} : vector<16x8xbf16>, vector<16x8xbf16>, vector<16x16xf32> -> vector<16x16xf32>
    "tpu.trace_stop"() : () -> ()
    %92 = arith.addf %91, %5 : vector<16x16xf32>
    %cst_33 = arith.constant dense<0xFF800000> : vector<16xf32>
    %93 = vector.multi_reduction <maximumf>, %92, %cst_33 [1] : vector<16x16xf32> to vector<16xf32>
    %94 = vector.shape_cast %93 : vector<16xf32> to vector<16x1xf32>
    %95 = vector.broadcast %94 : vector<16x1xf32> to vector<16x16xf32>
    %96 = arith.subf %92, %95 : vector<16x16xf32>
    %97 = math.exp %96 : vector<16x16xf32>
    %cst_34 = arith.constant dense<0.000000e+00> : vector<16xf32>
    %98 = vector.multi_reduction <add>, %97, %cst_34 [1] : vector<16x16xf32> to vector<16xf32>
    %99 = vector.shape_cast %98 : vector<16xf32> to vector<16x1xf32>
    %100 = tpu.reciprocal %99 {approx = true} : vector<16x1xf32> -> vector<16x1xf32>
    %101 = vector.broadcast %100 : vector<16x1xf32> to vector<16x16xf32>
    %102 = arith.mulf %97, %101 : vector<16x16xf32>
    %103 = arith.truncf %102 : vector<16x16xf32> to vector<16x16xbf16>
    %104 = vector.extract_strided_slice %37 {offsets = [0, 24], sizes = [16, 8], strides = [1, 1]} : vector<16x32xbf16> to vector<16x8xbf16>
    %cst_35 = arith.constant dense<0.000000e+00> : vector<16x8xf32>
    %105 = tpu.matmul %103, %104, %cst_35 {dimension_numbers = #tpu.dot_dimension_numbers<[1], [0], [0], [1], [0, 0, 1, 1], [], []>} : vector<16x16xbf16>, vector<16x8xbf16>, vector<16x8xf32> -> vector<16x8xf32>
    %106 = tpu.concatenate %54, %71, %88, %105 in 1 : vector<16x8xf32>, vector<16x8xf32>, vector<16x8xf32>, vector<16x8xf32> -> vector<16x32xf32>
    %107 = arith.truncf %106 : vector<16x32xf32> to vector<16x32xbf16>
    %c0_36 = arith.constant 0 : index
    %c0_37 = arith.constant 0 : index
    %c0_38 = arith.constant 0 : index
    %108 = vector.load %arg8[%c0_36, %c0_37, %c0_38] : memref<2x32x32xbf16, #tpu.memory_space<vmem>>, vector<1x32x32xbf16>
    %109 = vector.shape_cast %108 : vector<1x32x32xbf16> to vector<32x32xbf16>
    %cst_39 = arith.constant dense<0.000000e+00> : vector<16x32xf32>
    %110 = tpu.matmul %107, %109, %cst_39 {dimension_numbers = #tpu.dot_dimension_numbers<[1], [0], [0], [1], [0, 0, 1, 1], [], []>} : vector<16x32xbf16>, vector<32x32xbf16>, vector<16x32xf32> -> vector<16x32xf32>
    %111 = arith.addf %0, %110 : vector<16x32xf32>
    %c0_40 = arith.constant 0 : index
    %c0_41 = arith.constant 0 : index
    %c0_42 = arith.constant 0 : index
    %112 = vector.load %arg9[%c0_40, %c0_41, %c0_42] : memref<2x1x32xf32, #tpu.memory_space<vmem>>, vector<1x1x32xf32>
    %113 = vector.shape_cast %112 : vector<1x1x32xf32> to vector<1x32xf32>
    %114 = arith.mulf %111, %111 : vector<16x32xf32>
    %cst_43 = arith.constant dense<0.000000e+00> : vector<16xf32>
    %115 = vector.multi_reduction <add>, %114, %cst_43 [1] : vector<16x32xf32> to vector<16xf32>
    %116 = vector.shape_cast %115 : vector<16xf32> to vector<16x1xf32>
    %cst_44 = arith.constant 3.200000e+01 : f32
    %117 = vector.broadcast %cst_44 : f32 to vector<16x1xf32>
    %118 = arith.divf %116, %117 : vector<16x1xf32>
    %cst_45 = arith.constant 9.99999997E-7 : f32
    %119 = vector.broadcast %cst_45 : f32 to vector<16x1xf32>
    %120 = arith.addf %118, %119 : vector<16x1xf32>
    %121 = math.rsqrt %120 : vector<16x1xf32>
    %122 = vector.broadcast %121 : vector<16x1xf32> to vector<16x32xf32>
    %123 = arith.mulf %111, %122 : vector<16x32xf32>
    %124 = vector.broadcast %113 : vector<1x32xf32> to vector<16x32xf32>
    %125 = arith.mulf %123, %124 : vector<16x32xf32>
    %126 = arith.truncf %125 : vector<16x32xf32> to vector<16x32xbf16>
    %c0_46 = arith.constant 0 : index
    %c0_47 = arith.constant 0 : index
    %c0_48 = arith.constant 0 : index
    %127 = vector.load %arg10[%c0_46, %c0_47, %c0_48] : memref<2x32x128xbf16, #tpu.memory_space<vmem>>, vector<1x32x128xbf16>
    %128 = vector.shape_cast %127 : vector<1x32x128xbf16> to vector<32x128xbf16>
    %cst_49 = arith.constant dense<0.000000e+00> : vector<16x128xf32>
    %129 = tpu.matmul %126, %128, %cst_49 {dimension_numbers = #tpu.dot_dimension_numbers<[1], [0], [0], [1], [0, 0, 1, 1], [], []>} : vector<16x32xbf16>, vector<32x128xbf16>, vector<16x128xf32> -> vector<16x128xf32>
    %130 = vector.extract_strided_slice %129 {offsets = [0, 0], sizes = [16, 64], strides = [1, 1]} : vector<16x128xf32> to vector<16x64xf32>
    %131 = vector.extract_strided_slice %129 {offsets = [0, 64], sizes = [16, 64], strides = [1, 1]} : vector<16x128xf32> to vector<16x64xf32>
    %132 = arith.negf %130 : vector<16x64xf32>
    %133 = math.exp %132 : vector<16x64xf32>
    %cst_50 = arith.constant 1.000000e+00 : f32
    %134 = vector.broadcast %cst_50 : f32 to vector<16x64xf32>
    %135 = arith.addf %134, %133 : vector<16x64xf32>
    %136 = arith.divf %134, %135 : vector<16x64xf32>
    %137 = arith.mulf %130, %136 : vector<16x64xf32>
    %138 = arith.mulf %137, %131 : vector<16x64xf32>
    %139 = arith.truncf %138 : vector<16x64xf32> to vector<16x64xbf16>
    %c0_51 = arith.constant 0 : index
    %c0_52 = arith.constant 0 : index
    %c0_53 = arith.constant 0 : index
    %140 = vector.load %arg11[%c0_51, %c0_52, %c0_53] : memref<2x64x32xbf16, #tpu.memory_space<vmem>>, vector<1x64x32xbf16>
    %141 = vector.shape_cast %140 : vector<1x64x32xbf16> to vector<64x32xbf16>
    %cst_54 = arith.constant dense<0.000000e+00> : vector<16x32xf32>
    %142 = tpu.matmul %139, %141, %cst_54 {dimension_numbers = #tpu.dot_dimension_numbers<[1], [0], [0], [1], [0, 0, 1, 1], [], []>} : vector<16x64xbf16>, vector<64x32xbf16>, vector<16x32xf32> -> vector<16x32xf32>
    %143 = arith.addf %111, %142 : vector<16x32xf32>
    %c1 = arith.constant 1 : index
    %c0_55 = arith.constant 0 : index
    %c0_56 = arith.constant 0 : index
    %144 = vector.load %arg6[%c1, %c0_55, %c0_56] : memref<2x1x32xf32, #tpu.memory_space<vmem>>, vector<1x1x32xf32>
    %145 = vector.shape_cast %144 : vector<1x1x32xf32> to vector<1x32xf32>
    %146 = arith.mulf %143, %143 : vector<16x32xf32>
    %cst_57 = arith.constant dense<0.000000e+00> : vector<16xf32>
    %147 = vector.multi_reduction <add>, %146, %cst_57 [1] : vector<16x32xf32> to vector<16xf32>
    %148 = vector.shape_cast %147 : vector<16xf32> to vector<16x1xf32>
    %cst_58 = arith.constant 3.200000e+01 : f32
    %149 = vector.broadcast %cst_58 : f32 to vector<16x1xf32>
    %150 = arith.divf %148, %149 : vector<16x1xf32>
    %cst_59 = arith.constant 9.99999997E-7 : f32
    %151 = vector.broadcast %cst_59 : f32 to vector<16x1xf32>
    %152 = arith.addf %150, %151 : vector<16x1xf32>
    %153 = math.rsqrt %152 : vector<16x1xf32>
    %154 = vector.broadcast %153 : vector<16x1xf32> to vector<16x32xf32>
    %155 = arith.mulf %143, %154 : vector<16x32xf32>
    %156 = vector.broadcast %145 : vector<1x32xf32> to vector<16x32xf32>
    %157 = arith.mulf %155, %156 : vector<16x32xf32>
    %158 = arith.truncf %157 : vector<16x32xf32> to vector<16x32xbf16>
    %c1_60 = arith.constant 1 : index
    %c0_61 = arith.constant 0 : index
    %c0_62 = arith.constant 0 : index
    %159 = vector.load %arg7[%c1_60, %c0_61, %c0_62] : memref<2x32x160xbf16, #tpu.memory_space<vmem>>, vector<1x32x160xbf16>
    %160 = vector.shape_cast %159 : vector<1x32x160xbf16> to vector<32x160xbf16>
    %cst_63 = arith.constant dense<0.000000e+00> : vector<16x160xf32>
    %161 = tpu.matmul %158, %160, %cst_63 {dimension_numbers = #tpu.dot_dimension_numbers<[1], [0], [0], [1], [0, 0, 1, 1], [], []>} : vector<16x32xbf16>, vector<32x160xbf16>, vector<16x160xf32> -> vector<16x160xf32>
    %162 = vector.extract_strided_slice %161 {offsets = [0, 0], sizes = [16, 32], strides = [1, 1]} : vector<16x160xf32> to vector<16x32xf32>
    %163 = arith.mulf %162, %1 : vector<16x32xf32>
    %164 = vector.extract_strided_slice %161 {offsets = [0, 32], sizes = [16, 32], strides = [1, 1]} : vector<16x160xf32> to vector<16x32xf32>
    %165 = arith.mulf %164, %2 : vector<16x32xf32>
    %166 = arith.addf %163, %165 : vector<16x32xf32>
    %167 = vector.extract_strided_slice %161 {offsets = [0, 64], sizes = [16, 32], strides = [1, 1]} : vector<16x160xf32> to vector<16x32xf32>
    %168 = arith.mulf %167, %3 : vector<16x32xf32>
    %169 = vector.extract_strided_slice %161 {offsets = [0, 96], sizes = [16, 32], strides = [1, 1]} : vector<16x160xf32> to vector<16x32xf32>
    %170 = arith.mulf %169, %4 : vector<16x32xf32>
    %171 = arith.addf %168, %170 : vector<16x32xf32>
    %172 = vector.extract_strided_slice %161 {offsets = [0, 128], sizes = [16, 32], strides = [1, 1]} : vector<16x160xf32> to vector<16x32xf32>
    %173 = arith.truncf %166 : vector<16x32xf32> to vector<16x32xbf16>
    %174 = arith.truncf %171 : vector<16x32xf32> to vector<16x32xbf16>
    %175 = arith.truncf %172 : vector<16x32xf32> to vector<16x32xbf16>
    %176 = vector.extract_strided_slice %173 {offsets = [0, 0], sizes = [16, 8], strides = [1, 1]} : vector<16x32xbf16> to vector<16x8xbf16>
    %177 = vector.extract_strided_slice %174 {offsets = [0, 0], sizes = [16, 8], strides = [1, 1]} : vector<16x32xbf16> to vector<16x8xbf16>
    "tpu.trace_start"() <{level = 10 : i32, message = "qd,kd->qk"}> : () -> ()
    %cst_64 = arith.constant dense<0.000000e+00> : vector<16x16xf32>
    %178 = tpu.matmul %176, %177, %cst_64 {dimension_numbers = #tpu.dot_dimension_numbers<[1], [1], [0], [0], [0, 0, 1, 0], [], []>} : vector<16x8xbf16>, vector<16x8xbf16>, vector<16x16xf32> -> vector<16x16xf32>
    "tpu.trace_stop"() : () -> ()
    %179 = arith.addf %178, %5 : vector<16x16xf32>
    %cst_65 = arith.constant dense<0xFF800000> : vector<16xf32>
    %180 = vector.multi_reduction <maximumf>, %179, %cst_65 [1] : vector<16x16xf32> to vector<16xf32>
    %181 = vector.shape_cast %180 : vector<16xf32> to vector<16x1xf32>
    %182 = vector.broadcast %181 : vector<16x1xf32> to vector<16x16xf32>
    %183 = arith.subf %179, %182 : vector<16x16xf32>
    %184 = math.exp %183 : vector<16x16xf32>
    %cst_66 = arith.constant dense<0.000000e+00> : vector<16xf32>
    %185 = vector.multi_reduction <add>, %184, %cst_66 [1] : vector<16x16xf32> to vector<16xf32>
    %186 = vector.shape_cast %185 : vector<16xf32> to vector<16x1xf32>
    %187 = tpu.reciprocal %186 {approx = true} : vector<16x1xf32> -> vector<16x1xf32>
    %188 = vector.broadcast %187 : vector<16x1xf32> to vector<16x16xf32>
    %189 = arith.mulf %184, %188 : vector<16x16xf32>
    %190 = arith.truncf %189 : vector<16x16xf32> to vector<16x16xbf16>
    %191 = vector.extract_strided_slice %175 {offsets = [0, 0], sizes = [16, 8], strides = [1, 1]} : vector<16x32xbf16> to vector<16x8xbf16>
    %cst_67 = arith.constant dense<0.000000e+00> : vector<16x8xf32>
    %192 = tpu.matmul %190, %191, %cst_67 {dimension_numbers = #tpu.dot_dimension_numbers<[1], [0], [0], [1], [0, 0, 1, 1], [], []>} : vector<16x16xbf16>, vector<16x8xbf16>, vector<16x8xf32> -> vector<16x8xf32>
    %193 = vector.extract_strided_slice %173 {offsets = [0, 8], sizes = [16, 8], strides = [1, 1]} : vector<16x32xbf16> to vector<16x8xbf16>
    %194 = vector.extract_strided_slice %174 {offsets = [0, 8], sizes = [16, 8], strides = [1, 1]} : vector<16x32xbf16> to vector<16x8xbf16>
    "tpu.trace_start"() <{level = 10 : i32, message = "qd,kd->qk"}> : () -> ()
    %cst_68 = arith.constant dense<0.000000e+00> : vector<16x16xf32>
    %195 = tpu.matmul %193, %194, %cst_68 {dimension_numbers = #tpu.dot_dimension_numbers<[1], [1], [0], [0], [0, 0, 1, 0], [], []>} : vector<16x8xbf16>, vector<16x8xbf16>, vector<16x16xf32> -> vector<16x16xf32>
    "tpu.trace_stop"() : () -> ()
    %196 = arith.addf %195, %5 : vector<16x16xf32>
    %cst_69 = arith.constant dense<0xFF800000> : vector<16xf32>
    %197 = vector.multi_reduction <maximumf>, %196, %cst_69 [1] : vector<16x16xf32> to vector<16xf32>
    %198 = vector.shape_cast %197 : vector<16xf32> to vector<16x1xf32>
    %199 = vector.broadcast %198 : vector<16x1xf32> to vector<16x16xf32>
    %200 = arith.subf %196, %199 : vector<16x16xf32>
    %201 = math.exp %200 : vector<16x16xf32>
    %cst_70 = arith.constant dense<0.000000e+00> : vector<16xf32>
    %202 = vector.multi_reduction <add>, %201, %cst_70 [1] : vector<16x16xf32> to vector<16xf32>
    %203 = vector.shape_cast %202 : vector<16xf32> to vector<16x1xf32>
    %204 = tpu.reciprocal %203 {approx = true} : vector<16x1xf32> -> vector<16x1xf32>
    %205 = vector.broadcast %204 : vector<16x1xf32> to vector<16x16xf32>
    %206 = arith.mulf %201, %205 : vector<16x16xf32>
    %207 = arith.truncf %206 : vector<16x16xf32> to vector<16x16xbf16>
    %208 = vector.extract_strided_slice %175 {offsets = [0, 8], sizes = [16, 8], strides = [1, 1]} : vector<16x32xbf16> to vector<16x8xbf16>
    %cst_71 = arith.constant dense<0.000000e+00> : vector<16x8xf32>
    %209 = tpu.matmul %207, %208, %cst_71 {dimension_numbers = #tpu.dot_dimension_numbers<[1], [0], [0], [1], [0, 0, 1, 1], [], []>} : vector<16x16xbf16>, vector<16x8xbf16>, vector<16x8xf32> -> vector<16x8xf32>
    %210 = vector.extract_strided_slice %173 {offsets = [0, 16], sizes = [16, 8], strides = [1, 1]} : vector<16x32xbf16> to vector<16x8xbf16>
    %211 = vector.extract_strided_slice %174 {offsets = [0, 16], sizes = [16, 8], strides = [1, 1]} : vector<16x32xbf16> to vector<16x8xbf16>
    "tpu.trace_start"() <{level = 10 : i32, message = "qd,kd->qk"}> : () -> ()
    %cst_72 = arith.constant dense<0.000000e+00> : vector<16x16xf32>
    %212 = tpu.matmul %210, %211, %cst_72 {dimension_numbers = #tpu.dot_dimension_numbers<[1], [1], [0], [0], [0, 0, 1, 0], [], []>} : vector<16x8xbf16>, vector<16x8xbf16>, vector<16x16xf32> -> vector<16x16xf32>
    "tpu.trace_stop"() : () -> ()
    %213 = arith.addf %212, %5 : vector<16x16xf32>
    %cst_73 = arith.constant dense<0xFF800000> : vector<16xf32>
    %214 = vector.multi_reduction <maximumf>, %213, %cst_73 [1] : vector<16x16xf32> to vector<16xf32>
    %215 = vector.shape_cast %214 : vector<16xf32> to vector<16x1xf32>
    %216 = vector.broadcast %215 : vector<16x1xf32> to vector<16x16xf32>
    %217 = arith.subf %213, %216 : vector<16x16xf32>
    %218 = math.exp %217 : vector<16x16xf32>
    %cst_74 = arith.constant dense<0.000000e+00> : vector<16xf32>
    %219 = vector.multi_reduction <add>, %218, %cst_74 [1] : vector<16x16xf32> to vector<16xf32>
    %220 = vector.shape_cast %219 : vector<16xf32> to vector<16x1xf32>
    %221 = tpu.reciprocal %220 {approx = true} : vector<16x1xf32> -> vector<16x1xf32>
    %222 = vector.broadcast %221 : vector<16x1xf32> to vector<16x16xf32>
    %223 = arith.mulf %218, %222 : vector<16x16xf32>
    %224 = arith.truncf %223 : vector<16x16xf32> to vector<16x16xbf16>
    %225 = vector.extract_strided_slice %175 {offsets = [0, 16], sizes = [16, 8], strides = [1, 1]} : vector<16x32xbf16> to vector<16x8xbf16>
    %cst_75 = arith.constant dense<0.000000e+00> : vector<16x8xf32>
    %226 = tpu.matmul %224, %225, %cst_75 {dimension_numbers = #tpu.dot_dimension_numbers<[1], [0], [0], [1], [0, 0, 1, 1], [], []>} : vector<16x16xbf16>, vector<16x8xbf16>, vector<16x8xf32> -> vector<16x8xf32>
    %227 = vector.extract_strided_slice %173 {offsets = [0, 24], sizes = [16, 8], strides = [1, 1]} : vector<16x32xbf16> to vector<16x8xbf16>
    %228 = vector.extract_strided_slice %174 {offsets = [0, 24], sizes = [16, 8], strides = [1, 1]} : vector<16x32xbf16> to vector<16x8xbf16>
    "tpu.trace_start"() <{level = 10 : i32, message = "qd,kd->qk"}> : () -> ()
    %cst_76 = arith.constant dense<0.000000e+00> : vector<16x16xf32>
    %229 = tpu.matmul %227, %228, %cst_76 {dimension_numbers = #tpu.dot_dimension_numbers<[1], [1], [0], [0], [0, 0, 1, 0], [], []>} : vector<16x8xbf16>, vector<16x8xbf16>, vector<16x16xf32> -> vector<16x16xf32>
    "tpu.trace_stop"() : () -> ()
    %230 = arith.addf %229, %5 : vector<16x16xf32>
    %cst_77 = arith.constant dense<0xFF800000> : vector<16xf32>
    %231 = vector.multi_reduction <maximumf>, %230, %cst_77 [1] : vector<16x16xf32> to vector<16xf32>
    %232 = vector.shape_cast %231 : vector<16xf32> to vector<16x1xf32>
    %233 = vector.broadcast %232 : vector<16x1xf32> to vector<16x16xf32>
    %234 = arith.subf %230, %233 : vector<16x16xf32>
    %235 = math.exp %234 : vector<16x16xf32>
    %cst_78 = arith.constant dense<0.000000e+00> : vector<16xf32>
    %236 = vector.multi_reduction <add>, %235, %cst_78 [1] : vector<16x16xf32> to vector<16xf32>
    %237 = vector.shape_cast %236 : vector<16xf32> to vector<16x1xf32>
    %238 = tpu.reciprocal %237 {approx = true} : vector<16x1xf32> -> vector<16x1xf32>
    %239 = vector.broadcast %238 : vector<16x1xf32> to vector<16x16xf32>
    %240 = arith.mulf %235, %239 : vector<16x16xf32>
    %241 = arith.truncf %240 : vector<16x16xf32> to vector<16x16xbf16>
    %242 = vector.extract_strided_slice %175 {offsets = [0, 24], sizes = [16, 8], strides = [1, 1]} : vector<16x32xbf16> to vector<16x8xbf16>
    %cst_79 = arith.constant dense<0.000000e+00> : vector<16x8xf32>
    %243 = tpu.matmul %241, %242, %cst_79 {dimension_numbers = #tpu.dot_dimension_numbers<[1], [0], [0], [1], [0, 0, 1, 1], [], []>} : vector<16x16xbf16>, vector<16x8xbf16>, vector<16x8xf32> -> vector<16x8xf32>
    %244 = tpu.concatenate %192, %209, %226, %243 in 1 : vector<16x8xf32>, vector<16x8xf32>, vector<16x8xf32>, vector<16x8xf32> -> vector<16x32xf32>
    %245 = arith.truncf %244 : vector<16x32xf32> to vector<16x32xbf16>
    %c1_80 = arith.constant 1 : index
    %c0_81 = arith.constant 0 : index
    %c0_82 = arith.constant 0 : index
    %246 = vector.load %arg8[%c1_80, %c0_81, %c0_82] : memref<2x32x32xbf16, #tpu.memory_space<vmem>>, vector<1x32x32xbf16>
    %247 = vector.shape_cast %246 : vector<1x32x32xbf16> to vector<32x32xbf16>
    %cst_83 = arith.constant dense<0.000000e+00> : vector<16x32xf32>
    %248 = tpu.matmul %245, %247, %cst_83 {dimension_numbers = #tpu.dot_dimension_numbers<[1], [0], [0], [1], [0, 0, 1, 1], [], []>} : vector<16x32xbf16>, vector<32x32xbf16>, vector<16x32xf32> -> vector<16x32xf32>
    %249 = arith.addf %143, %248 : vector<16x32xf32>
    %c1_84 = arith.constant 1 : index
    %c0_85 = arith.constant 0 : index
    %c0_86 = arith.constant 0 : index
    %250 = vector.load %arg9[%c1_84, %c0_85, %c0_86] : memref<2x1x32xf32, #tpu.memory_space<vmem>>, vector<1x1x32xf32>
    %251 = vector.shape_cast %250 : vector<1x1x32xf32> to vector<1x32xf32>
    %252 = arith.mulf %249, %249 : vector<16x32xf32>
    %cst_87 = arith.constant dense<0.000000e+00> : vector<16xf32>
    %253 = vector.multi_reduction <add>, %252, %cst_87 [1] : vector<16x32xf32> to vector<16xf32>
    %254 = vector.shape_cast %253 : vector<16xf32> to vector<16x1xf32>
    %cst_88 = arith.constant 3.200000e+01 : f32
    %255 = vector.broadcast %cst_88 : f32 to vector<16x1xf32>
    %256 = arith.divf %254, %255 : vector<16x1xf32>
    %cst_89 = arith.constant 9.99999997E-7 : f32
    %257 = vector.broadcast %cst_89 : f32 to vector<16x1xf32>
    %258 = arith.addf %256, %257 : vector<16x1xf32>
    %259 = math.rsqrt %258 : vector<16x1xf32>
    %260 = vector.broadcast %259 : vector<16x1xf32> to vector<16x32xf32>
    %261 = arith.mulf %249, %260 : vector<16x32xf32>
    %262 = vector.broadcast %251 : vector<1x32xf32> to vector<16x32xf32>
    %263 = arith.mulf %261, %262 : vector<16x32xf32>
    %264 = arith.truncf %263 : vector<16x32xf32> to vector<16x32xbf16>
    %c1_90 = arith.constant 1 : index
    %c0_91 = arith.constant 0 : index
    %c0_92 = arith.constant 0 : index
    %265 = vector.load %arg10[%c1_90, %c0_91, %c0_92] : memref<2x32x128xbf16, #tpu.memory_space<vmem>>, vector<1x32x128xbf16>
    %266 = vector.shape_cast %265 : vector<1x32x128xbf16> to vector<32x128xbf16>
    %cst_93 = arith.constant dense<0.000000e+00> : vector<16x128xf32>
    %267 = tpu.matmul %264, %266, %cst_93 {dimension_numbers = #tpu.dot_dimension_numbers<[1], [0], [0], [1], [0, 0, 1, 1], [], []>} : vector<16x32xbf16>, vector<32x128xbf16>, vector<16x128xf32> -> vector<16x128xf32>
    %268 = vector.extract_strided_slice %267 {offsets = [0, 0], sizes = [16, 64], strides = [1, 1]} : vector<16x128xf32> to vector<16x64xf32>
    %269 = vector.extract_strided_slice %267 {offsets = [0, 64], sizes = [16, 64], strides = [1, 1]} : vector<16x128xf32> to vector<16x64xf32>
    %270 = arith.negf %268 : vector<16x64xf32>
    %271 = math.exp %270 : vector<16x64xf32>
    %cst_94 = arith.constant 1.000000e+00 : f32
    %272 = vector.broadcast %cst_94 : f32 to vector<16x64xf32>
    %273 = arith.addf %272, %271 : vector<16x64xf32>
    %274 = arith.divf %272, %273 : vector<16x64xf32>
    %275 = arith.mulf %268, %274 : vector<16x64xf32>
    %276 = arith.mulf %275, %269 : vector<16x64xf32>
    %277 = arith.truncf %276 : vector<16x64xf32> to vector<16x64xbf16>
    %c1_95 = arith.constant 1 : index
    %c0_96 = arith.constant 0 : index
    %c0_97 = arith.constant 0 : index
    %278 = vector.load %arg11[%c1_95, %c0_96, %c0_97] : memref<2x64x32xbf16, #tpu.memory_space<vmem>>, vector<1x64x32xbf16>
    %279 = vector.shape_cast %278 : vector<1x64x32xbf16> to vector<64x32xbf16>
    %cst_98 = arith.constant dense<0.000000e+00> : vector<16x32xf32>
    %280 = tpu.matmul %277, %279, %cst_98 {dimension_numbers = #tpu.dot_dimension_numbers<[1], [0], [0], [1], [0, 0, 1, 1], [], []>} : vector<16x64xbf16>, vector<64x32xbf16>, vector<16x32xf32> -> vector<16x32xf32>
    %281 = arith.addf %249, %280 : vector<16x32xf32>
    %c0_99 = arith.constant 0 : index
    %c0_100 = arith.constant 0 : index
    %282 = vector.load %arg12[%c0_99, %c0_100] : memref<1x32xf32, #tpu.memory_space<vmem>>, vector<1x32xf32>
    %283 = arith.mulf %281, %281 : vector<16x32xf32>
    %cst_101 = arith.constant dense<0.000000e+00> : vector<16xf32>
    %284 = vector.multi_reduction <add>, %283, %cst_101 [1] : vector<16x32xf32> to vector<16xf32>
    %285 = vector.shape_cast %284 : vector<16xf32> to vector<16x1xf32>
    %cst_102 = arith.constant 3.200000e+01 : f32
    %286 = vector.broadcast %cst_102 : f32 to vector<16x1xf32>
    %287 = arith.divf %285, %286 : vector<16x1xf32>
    %cst_103 = arith.constant 9.99999997E-7 : f32
    %288 = vector.broadcast %cst_103 : f32 to vector<16x1xf32>
    %289 = arith.addf %287, %288 : vector<16x1xf32>
    %290 = math.rsqrt %289 : vector<16x1xf32>
    %291 = vector.broadcast %290 : vector<16x1xf32> to vector<16x32xf32>
    %292 = arith.mulf %281, %291 : vector<16x32xf32>
    %293 = vector.broadcast %282 : vector<1x32xf32> to vector<16x32xf32>
    %294 = arith.mulf %292, %293 : vector<16x32xf32>
    %295 = arith.truncf %294 : vector<16x32xf32> to vector<16x32xbf16>
    %c0_104 = arith.constant 0 : index
    %c0_105 = arith.constant 0 : index
    %296 = vector.load %arg13[%c0_104, %c0_105] : memref<32x128xbf16, #tpu.memory_space<vmem>>, vector<32x128xbf16>
    %cst_106 = arith.constant dense<0.000000e+00> : vector<16x128xf32>
    %297 = tpu.matmul %295, %296, %cst_106 {dimension_numbers = #tpu.dot_dimension_numbers<[1], [0], [0], [1], [0, 0, 1, 1], [], []>} : vector<16x32xbf16>, vector<32x128xbf16>, vector<16x128xf32> -> vector<16x128xf32>
    %c0_107 = arith.constant 0 : index
    %c0_108 = arith.constant 0 : index
    %298 = vector.load %arg14[%c0_107, %c0_108] : memref<16x128xf32, #tpu.memory_space<vmem>>, vector<16x128xf32>
    tpu.vector_store %arg14[%c0_107, %c0_108], %297 {strides = array<i32>} : memref<16x128xf32, #tpu.memory_space<vmem>>, vector<16x128xf32>,
    return
  }
}

</mosaic_0001>

<bundles_post_ra>
// kernel: tpu_custom_call.1
= control target key start
LH: loop header
LB: loop body
LE: loop exit
PB: predicated region body
PF: predicated region fallthrough
CT: control target
= control target key end

     0   :  { %19 = vsyncpa [#allocation3], 0  ;;  %s3486_s0 = inlined_call_operand.hbm [shape: f32[16,32], index: 0, kind: input, shape index: {}]   ;;  %s3487_s1 = inlined_call_operand.hbm [shape: f32[16,32], index: 1, kind: input, shape index: {}]   ;;  %s3488_s2 = inlined_call_operand.hbm [shape: f32[16,32], index: 2, kind: input, shape index: {}]   ;;  %s3489_s3 = inlined_call_operand.hbm [shape: f32[16,32], index: 3, kind: input, shape index: {}]   ;;  %s3490_s4 = inlined_call_operand.hbm [shape: f32[16,32], index: 4, kind: input, shape index: {}]   ;;  %s3491_s5 = inlined_call_operand.hbm [shape: f32[16,16], index: 5, kind: input, shape index: {}]   ;;  %s3492_s6 = inlined_call_operand.hbm [shape: f32[2,1,32], index: 6, kind: input, shape index: {}]   ;;  %s3493_s7 = inlined_call_operand.vmem [shape: bf16[2,32,160], index: 7, kind: input, shape index: {}]   ;;  %s3494_s8 = inlined_call_operand.vmem [shape: bf16[2,32,32], index: 8, kind: input, shape index: {}]   ;;  %s3495_s9 = inlined_call_operand.hbm [shape: f32[2,1,32], index: 9, kind: input, shape index: {}]   ;;  %s3496_s10 = inlined_call_operand.hbm [shape: bf16[2,32,128], index: 10, kind: input, shape index: {}]   ;;  %s3497_s11 = inlined_call_operand.vmem [shape: bf16[2,64,32], index: 11, kind: input, shape index: {}]   ;;  %s3498_s12 = inlined_call_operand.vmem [shape: f32[1,32], index: 12, kind: input, shape index: {}]   ;;  %s3499_s13 = inlined_call_operand.vmem [shape: bf16[32,128], index: 13, kind: input, shape index: {}]   ;;  %s3500_s14 = inlined_call_operand.hbm [shape: f32[16,128], index: 14, kind: output, shape index: {}]  }
   0x1   :  { %20 = vsyncpa [#allocation6], 0 }
   0x2   :  { %21 = vsyncpa [#allocation9], 0 }
   0x3   :  { %22 = vsyncpa [#allocation12], 0 }
   0x4   :  { %23 = vsyncpa [#allocation15], 0 }
   0x5   :  { %24 = vsyncpa [#allocation4], 0  ;;  %s2823_s29 = smov [#allocation5]   ;;  %s2824_s15 = smov [#allocation8]  }
   0x6   :  { %s42_s30 = sshll.u32 %s2823_s29, 4  ;;  %s66_s16 = sshll.u32 %s2824_s15, 4  ;;  %s43_s30 = int_to_ptr.vmem [resolvable:$true] %s42_s30  ;;  %s2926_s16 = int_to_ptr.vmem [resolvable:$true] %s66_s16 }
   0x7   :  { %s2591_s19 = scalar_lea.hbm %s3487_s1, 256 }
   0x8   :  { %p2592_p0 = scmp.ne.s32.totalorder %s3487_s1, %s2591_s19  ;;  %p2595_p1 = scmp.lt.u32.totalorder %s2591_s19, %s3487_s1 }
   0xa   :  { %p2597_p2 = pnand %p2595_p1, %p2592_p0 }
   0xc   :  { %2600 = shalt.err (!%p2597_p2)
}
   0xd   :  { %s2601_s24 = scalar_lea.vmem %s43_s30, 256  ;;  %p2606_p4 = scmp.lt.s32.totalorder %s43_s30, %s43_s30 }
   0xe   :  { %p2602_p3 = scmp.ne.s32.totalorder %s43_s30, %s2601_s24  ;;  %p2607_p5 = scmp.lt.s32.totalorder %s2601_s24, %s2601_s24 }
  0x10   :  { %p2608_p6 = por %p2607_p5, %p2606_p4 }
  0x12   :  { %p2609_p7 = pnand %p2608_p6, %p2602_p3 }
  0x14   :  { %2612 = shalt.err (!%p2609_p7)
}
  0x15   :  { %s2825_s25 = smov 128   ;;  %s2826_s26 = smov 8  }
  0x16   :  { %48 = dma.hbm_to_vmem [thread:$0]  %s3487_s1, 256, %s43_s30, [#allocation6], %s2825_s25, %s2825_s25, %s2826_s26  }
  0x17   :  { %s2613_s17 = scalar_lea.hbm %s3489_s3, 256 }
  0x18   :  { %p2614_p8 = scmp.ne.s32.totalorder %s3489_s3, %s2613_s17  ;;  %p2617_p9 = scmp.lt.u32.totalorder %s2613_s17, %s3489_s3 }
  0x1a   :  { %p2619_p10 = pnand %p2617_p9, %p2614_p8 }
  0x1c   :  { %2622 = shalt.err (!%p2619_p10)
}
  0x1d   :  { %s2623_s22 = scalar_lea.vmem %s2926_s16, 256  ;;  %p2628_p12 = scmp.lt.s32.totalorder %s2926_s16, %s2926_s16 }
  0x1e   :  { %p2624_p11 = scmp.ne.s32.totalorder %s2926_s16, %s2623_s22  ;;  %p2629_p13 = scmp.lt.s32.totalorder %s2623_s22, %s2623_s22 }
  0x20   :  { %p2630_p0 = por %p2629_p13, %p2628_p12 }
  0x22   :  { %p2631_p1 = pnand %p2630_p0, %p2624_p11 }
  0x24   :  { %2634 = shalt.err (!%p2631_p1)
}
  0x25   :  { %72 = dma.hbm_to_vmem [thread:$0]  %s3489_s3, 256, %s2926_s16, [#allocation9], %s2825_s25, %s2825_s25, %s2826_s26  }
  0x26   :  { %s2827_s23 = smov [#allocation11]   ;;  %s2635_s29 = scalar_lea.hbm %s3491_s5, 256 }
  0x27   :  { %s90_s24 = sshll.u32 %s2827_s23, 4  ;;  %p2636_p2 = scmp.ne.s32.totalorder %s3491_s5, %s2635_s29  ;;  %s91_s24 = int_to_ptr.vmem [resolvable:$true] %s90_s24 }
  0x28   :  { %p2639_p3 = scmp.lt.u32.totalorder %s2635_s29, %s3491_s5 }
  0x2a   :  { %p2641_p4 = pnand %p2639_p3, %p2636_p2 }
  0x2c   :  { %2644 = shalt.err (!%p2641_p4)
}
  0x2d   :  { %s2645_s20 = scalar_lea.vmem %s91_s24, 256  ;;  %p2650_p6 = scmp.lt.s32.totalorder %s91_s24, %s91_s24 }
  0x2e   :  { %p2646_p5 = scmp.ne.s32.totalorder %s91_s24, %s2645_s20  ;;  %p2651_p7 = scmp.lt.s32.totalorder %s2645_s20, %s2645_s20 }
  0x30   :  { %p2652_p8 = por %p2651_p7, %p2650_p6 }
  0x32   :  { %p2653_p9 = pnand %p2652_p8, %p2646_p5 }
  0x34   :  { %2656 = shalt.err (!%p2653_p9)
}
  0x35   :  { %96 = dma.hbm_to_vmem [thread:$0]  %s3491_s5, 256, %s91_s24, [#allocation12], %s2825_s25, %s2825_s25, %s2826_s26  }
  0x36   :  { %s2828_s21 = smov [#allocation14]   ;;  %s2829_s1 = smov [#allocation2]  }
  0x37   :  { %s118_s22 = sshll.u32 %s2828_s21, 4  ;;  %s30_s30 = sshll.u32 %s2829_s1, 4  ;;  %s119_s22 = int_to_ptr.vmem [resolvable:$true] %s118_s22  ;;  %s31_s30 = int_to_ptr.vmem [resolvable:$true] %s30_s30 }
  0x38   :  { %s2657_s28 = scalar_lea.hbm %s3495_s9, 32 }
  0x39   :  { %p2658_p10 = scmp.ne.s32.totalorder %s3495_s9, %s2657_s28  ;;  %p2661_p11 = scmp.lt.u32.totalorder %s2657_s28, %s3495_s9 }
  0x3b   :  { %p2663_p12 = pnand %p2661_p11, %p2658_p10 }
  0x3d   :  { %2666 = shalt.err (!%p2663_p12)
}
  0x3e   :  { %s2667_s5 = scalar_lea.vmem %s119_s22, 32  ;;  %p2672_p0 = scmp.lt.s32.totalorder %s119_s22, %s119_s22 }
  0x3f   :  { %p2668_p13 = scmp.ne.s32.totalorder %s119_s22, %s2667_s5  ;;  %p2673_p1 = scmp.lt.s32.totalorder %s2667_s5, %s2667_s5 }
  0x41   :  { %p2674_p2 = por %p2673_p1, %p2672_p0 }
  0x43   :  { %p2675_p3 = pnand %p2674_p2, %p2668_p13 }
  0x45   :  { %2678 = shalt.err (!%p2675_p3)
}
  0x46   :  { %s2830_s24 = smov 16   ;;  %s2831_s19 = smov 1  }
  0x47   :  { %124 = dma.hbm_to_vmem [thread:$0]  %s3495_s9, 32, %s119_s22, [#allocation15], %s2830_s24, %s2830_s24, %s2831_s19  }
  0x48   :  { %s2679_s1 = scalar_lea.hbm %s3486_s0, 256 }
  0x49   :  { %p2680_p4 = scmp.ne.s32.totalorder %s3486_s0, %s2679_s1  ;;  %p2683_p5 = scmp.lt.u32.totalorder %s2679_s1, %s3486_s0 }
  0x4b   :  { %p2685_p6 = pnand %p2683_p5, %p2680_p4 }
  0x4d   :  { %2688 = shalt.err (!%p2685_p6)
}
  0x4e   :  { %s2689_s15 = scalar_lea.vmem %s31_s30, 256  ;;  %p2694_p8 = scmp.lt.s32.totalorder %s31_s30, %s31_s30 }
  0x4f   :  { %p2690_p7 = scmp.ne.s32.totalorder %s31_s30, %s2689_s15  ;;  %p2695_p9 = scmp.lt.s32.totalorder %s2689_s15, %s2689_s15 }
  0x51   :  { %p2696_p10 = por %p2695_p9, %p2694_p8 }
  0x53   :  { %p2697_p11 = pnand %p2696_p10, %p2690_p7 }
  0x55   :  { %2700 = shalt.err (!%p2697_p11)
}
  0x56   :  { %36 = dma.hbm_to_vmem [thread:$0]  %s3486_s0, 256, %s31_s30, [#allocation3], %s2825_s25, %s2825_s25, %s2826_s26  }
  0x57   :  { %s2832_s17 = smov [#allocation7]   ;;  %s2833_s5 = smov [#allocation10]  }
  0x58   :  { %s54_s18 = sshll.u32 %s2832_s17, 4  ;;  %s78_s20 = sshll.u32 %s2833_s5, 4  ;;  %s55_s18 = int_to_ptr.vmem [resolvable:$true] %s54_s18  ;;  %s79_s20 = int_to_ptr.vmem [resolvable:$true] %s78_s20 }
  0x59   :  { %s2701_s21 = scalar_lea.hbm %s3488_s2, 256 }
  0x5a   :  { %p2702_p12 = scmp.ne.s32.totalorder %s3488_s2, %s2701_s21  ;;  %p2705_p13 = scmp.lt.u32.totalorder %s2701_s21, %s3488_s2 }
  0x5c   :  { %p2707_p0 = pnand %p2705_p13, %p2702_p12 }
  0x5e   :  { %2710 = shalt.err (!%p2707_p0)
}
  0x5f   :  { %s2711_s0 = scalar_lea.vmem %s55_s18, 256  ;;  %p2716_p2 = scmp.lt.s32.totalorder %s55_s18, %s55_s18 }
  0x60   :  { %p2712_p1 = scmp.ne.s32.totalorder %s55_s18, %s2711_s0  ;;  %p2717_p3 = scmp.lt.s32.totalorder %s2711_s0, %s2711_s0 }
  0x62   :  { %p2718_p4 = por %p2717_p3, %p2716_p2 }
  0x64   :  { %p2719_p5 = pnand %p2718_p4, %p2712_p1 }
  0x66   :  { %2722 = shalt.err (!%p2719_p5)
}
  0x67   :  { %60 = dma.hbm_to_vmem [thread:$0]  %s3488_s2, 256, %s55_s18, [#allocation6], %s2825_s25, %s2825_s25, %s2826_s26  }
  0x68   :  { %s2723_s22 = scalar_lea.hbm %s3490_s4, 256 }
  0x69   :  { %p2724_p6 = scmp.ne.s32.totalorder %s3490_s4, %s2723_s22  ;;  %p2727_p7 = scmp.lt.u32.totalorder %s2723_s22, %s3490_s4 }
  0x6b   :  { %p2729_p8 = pnand %p2727_p7, %p2724_p6 }
  0x6d   :  { %2732 = shalt.err (!%p2729_p8)
}
  0x6e   :  { %s2733_s21 = scalar_lea.vmem %s79_s20, 256  ;;  %p2738_p10 = scmp.lt.s32.totalorder %s79_s20, %s79_s20 }
  0x6f   :  { %p2734_p9 = scmp.ne.s32.totalorder %s79_s20, %s2733_s21  ;;  %p2739_p11 = scmp.lt.s32.totalorder %s2733_s21, %s2733_s21 }
  0x71   :  { %p2740_p12 = por %p2739_p11, %p2738_p10 }
  0x73   :  { %p2741_p13 = pnand %p2740_p12, %p2734_p9 }
  0x75   :  { %2744 = shalt.err (!%p2741_p13)
}
  0x76   :  { %84 = dma.hbm_to_vmem [thread:$0]  %s3490_s4, 256, %s79_s20, [#allocation9], %s2825_s25, %s2825_s25, %s2826_s26  }
  0x77   :  { %s2834_s1 = smov [#allocation13]   ;;  %s2835_s27 = smov [#allocation16]  }
  0x78   :  { %s102_s23 = sshll.u32 %s2834_s1, 4  ;;  %s130_s28 = sshll.u32 %s2835_s27, 4  ;;  %s103_s23 = int_to_ptr.vmem [resolvable:$true] %s102_s23  ;;  %s131_s28 = int_to_ptr.vmem [resolvable:$true] %s130_s28 }
  0x79   :  { %s2745_s29 = scalar_lea.hbm %s3492_s6, 32 }
  0x7a   :  { %p2746_p0 = scmp.ne.s32.totalorder %s3492_s6, %s2745_s29  ;;  %p2749_p1 = scmp.lt.u32.totalorder %s2745_s29, %s3492_s6 }
  0x7c   :  { %p2751_p2 = pnand %p2749_p1, %p2746_p0 }
  0x7e   :  { %2754 = shalt.err (!%p2751_p2)
}
  0x7f   :  { %s2755_s4 = scalar_lea.vmem %s103_s23, 32  ;;  %p2760_p4 = scmp.lt.s32.totalorder %s103_s23, %s103_s23 }
  0x80   :  { %p2756_p3 = scmp.ne.s32.totalorder %s103_s23, %s2755_s4  ;;  %p2761_p5 = scmp.lt.s32.totalorder %s2755_s4, %s2755_s4 }
  0x82   :  { %p2762_p6 = por %p2761_p5, %p2760_p4 }
  0x84   :  { %p2763_p7 = pnand %p2762_p6, %p2756_p3 }
  0x86   :  { %2766 = shalt.err (!%p2763_p7)
}
  0x87   :  { %108 = dma.hbm_to_vmem [thread:$0]  %s3492_s6, 32, %s103_s23, [#allocation12], %s2830_s24, %s2830_s24, %s2831_s19  }
  0x88   :  { %s2767_s21 = scalar_lea.hbm %s3496_s10, 512 }
  0x89   :  { %p2768_p8 = scmp.ne.s32.totalorder %s3496_s10, %s2767_s21  ;;  %p2771_p9 = scmp.lt.u32.totalorder %s2767_s21, %s3496_s10 }
  0x8b   :  { %p2773_p10 = pnand %p2771_p9, %p2768_p8 }
  0x8d   :  { %2776 = shalt.err (!%p2773_p10)
}
  0x8e   :  { %s2777_s0 = scalar_lea.vmem %s131_s28, 512  ;;  %p2782_p12 = scmp.lt.s32.totalorder %s131_s28, %s131_s28 }
  0x8f   :  { %p2778_p11 = scmp.ne.s32.totalorder %s131_s28, %s2777_s0  ;;  %p2783_p13 = scmp.lt.s32.totalorder %s2777_s0, %s2777_s0 }
  0x91   :  { %p2784_p0 = por %p2783_p13, %p2782_p12 }
  0x93   :  { %p2785_p1 = pnand %p2784_p0, %p2778_p11 }
  0x95   :  { %2788 = shalt.err (!%p2785_p1)
}
  0x96   :  { %s2836_s6 = smov 64   ;;  %s2837_s19 = smov 4  }
  0x97   :  { %136 = dma.hbm_to_vmem [thread:$0]  %s3496_s10, 512, %s131_s28, [#allocation15], %s2836_s6, %s2836_s6, %s2837_s19  }
  0x98   :  { %2811 = dma.done.wait [#allocation3], 256  }
  0x99   :  { %2812 = vsyncadd [#allocation3], 4294967040 }
  0x9a   :  { %2813 = dma.done.wait [#allocation6], 512  }
  0x9b   :  { %2814 = vsyncadd [#allocation6], 4294966784 }
  0x9c   :  { %2815 = dma.done.wait [#allocation9], 512  }
  0x9d   :  { %2816 = vsyncadd [#allocation9], 4294966784 }
  0x9e   :  { %2817 = dma.done.wait [#allocation12], 288  }
  0x9f   :  { %2818 = vsyncadd [#allocation12], 4294967008 }
  0xa0   :  { %2819 = dma.done.wait [#allocation15], 544  }
  0xa1   :  { %2820 = vsyncadd [#allocation15], 4294966752  ;;  %v3067_v0 = vld [vmem:[#allocation2] sm:$0xff]  ;;  %vm186_vm0 = vcmask 261120   ;;  %v3069_v1 = vld [vmem:[#allocation2 + $0x8] sm:$0xff]  ;;  %v2838_v9 = vmov 0  }
  0xa2   :  { %v184_v2 = vmul.f32 %v3067_v0, %v3067_v0  ;;  %v185_v3 = vmul.f32 %v3069_v1, %v3069_v1  ;;  %v2461_v6 = vld [vmem:[%s3493_s7 + $0x4] ss:$8 sps:$4 sm:$0xff]   ;;  %v2463_v7 = vld [vmem:[%s3493_s7] ss:$8 sps:$4 sm:$0xff]   ;;  %v2464_v8 = vld [vmem:[%s3493_s7 + $0x14] ss:$8 sps:$4 sm:$0xff]   ;;  %270 = vmatprep.mubr.bf16.mxu0 %v2838_v9 }
  0xa3   :  { %238 = vmatprep.subr.bf16.mxu0 %v2461_v6  ;;  %v2466_v10 = vld [vmem:[%s3493_s7 + $0x10] ss:$8 sps:$4 sm:$0xff]   ;;  %v179_v11 = vld [vmem:[#allocation10] sm:$0xff]  ;;  %s2839_s20 = smov 96   ;;  %v180_v13 = vld [vmem:[#allocation10 + $0x8] sm:$0xff]  ;;  %s2840_s5 = smov 32  }
  0xa4   :  { %v187_v4 = vsel %vm186_vm0, %v184_v2, 0.0  ;;  %v190_v5 = vsel %vm186_vm0, %v185_v3, 0.0  ;;  %239 = vmatpush1.bf16.msra.mxu0 %v2463_v7  ;;  %315 = vrot.lane.b32.xlu1 %v179_v11, %s2839_s20  ;;  %v175_v12 = vld [vmem:[#allocation7] sm:$0xff]  ;;  %v176_v14 = vld [vmem:[#allocation7 + $0x8] sm:$0xff]  ;;  %v177_v15 = vld [vmem:[#allocation8] sm:$0xff]  ;;  %v2841_v31 = vmov 0.0  }
  0xa5   :  { %188 = vadd.xlane.f32.xlu0 %v187_v4  ;;  %240 = vmatprep.subr.bf16.mxu0 %v2464_v8  ;;  %v178_v16 = vld [vmem:[#allocation8 + $0x8] sm:$0xff]  ;;  %v2110_v26 = vld [vmem:[#allocation13] ss:$0 sm:$0xff]  ;;  %vm2842_vm1 = vmmov 0   ;;  %v3131_v52 = vld [vmem:[#allocation5] sm:$0xff]  ;;  %s2843_s3 = smov 56  }
  0xa6   :  { %2243 = vmatprep.subr.bf16.mxu1 %v2841_v31  ;;  %2245 = vmatprep.mubr.msk.bf16.mxu1 %vm2842_vm1, %v2841_v31  ;;  %v3129_v50 = vld [vmem:[#allocation5 + $0x8] sm:$0xff]  ;;  %s2844_s16 = smov 48   ;;  %s2845_s21 = smov 120   ;;  %vm339_vm2 = vcmask 64512   ;;  %vm387_vm3 = vcmask 130048   ;;  %vm848_vm4 = vcmask 195584  }
  0xa7   :  { %s2846_s2 = smov 40   ;;  %s2847_s18 = smov 112   ;;  %vm1057_vm5 = vcmask 523264  }
  0xa8   :  { %241 = vmatpush1.bf16.msra.mxu0 %v2466_v10  ;;  %317 = vrot.lane.b32.xlu1 %v180_v13, %s2839_s20  ;;  %s2848_s1 = smov 104   ;;  %v3162_v13 = vld [vmem:[#allocation11] sm:$0xff]  ;;  %s2849_s30 = smov 24  }
  0xa9   :  { %191 = vadd.xlane.f32.xlu0 %v190_v5  ;;  %2249 = vmatprep.subr.bf16.mxu0 %v2841_v31 }
  0xac   :  { %287 = vrot.lane.b32.xlu1 %v176_v14, %s2840_s5 }
  0xb0   :  { %305 = vrot.lane.b32.xlu1 %v177_v15, %s2836_s6  ;;  %v3164_v15 = vld [vmem:[#allocation11 + $0x8] sm:$0xff] }
  0xb4   :  { %307 = vrot.lane.b32.xlu1 %v178_v16, %s2836_s6 }
  0xbf   :  { %285 = vrot.lane.b32.xlu0 %v175_v12, %s2840_s5 }
 0x116   :  { %v3099_v32 = vpop.permute.xlu1 %315 }
 0x11a   :  { %v3101_v33 = vpop.permute.xlu1 %317 }
 0x11e   :  { %v3104_v37 = vpop.permute.xlu1 %287 }
 0x122   :  { %v3119_v45 = vpop.permute.xlu1 %305 }
 0x126   :  { %v3121_v46 = vpop.permute.xlu1 %307 }
 0x132   :  { %v189_v17 = vpop.xlane.xlu0 %188 }
 0x133   :  { %v194_v18 = vmul.f32 0.03125, %v189_v17 }
 0x135   :  { %v196_v19 = vadd.f32 1e-06, %v194_v18 }
 0x136   :  { %v192_v20 = vpop.xlane.xlu0 %191 }
 0x137   :  { %2491 = vrsqrt.f32 %v196_v19  ;;  %v195_v21 = vmul.f32 0.03125, %v192_v20 }
 0x139   :  { %v197_v22 = vadd.f32 1e-06, %v195_v21 }
 0x13a   :  { %v3112_v43 = vpop.permute.xlu0 %285 }
 0x13b   :  { %2493 = vrsqrt.f32 %v197_v22 }
 0x141   :  { %v2492_v23 = vpop.eup %2491 }
 0x142   :  { %v200_v24 = vmul.f32 %v2492_v23, %v3067_v0 }
 0x144   :  { %v208_v28 = vmul.f32 %v2110_v26, %v200_v24 }
 0x145   :  { %v2494_v25 = vpop.eup %2493 }
 0x146   :  { %v201_v27 = vmul.f32 %v2494_v25, %v3069_v1 }
 0x148   :  { %v209_v29 = vmul.f32 %v2110_v26, %v201_v27 }
 0x14a   :  { %v210_v30 = vpack.c.bf16 %v209_v29, %v208_v28 }
 0x14c   :  { %2115 = vmatmul.mubr.msk.bf16.vlgmr.msra.gmra.mrb[0].mxu0 %vm186_vm0, %v210_v30 }
 0x14d   :  { %2251 = vmatprep.mubr.msk.bf16.mxu0 %vm2842_vm1, %v2841_v31 }
 0x21f   :  { %v272_v34 = vpop.f32.mrb[0].mxu0 }
 0x220   :  { %v274_v35 = vpop.f32.mrb[1].mxu0  ;;  %v321_v36 = vmul.f32 %v3099_v32, %v272_v34  ;;  %v291_v44 = vmul.f32 %v3112_v43, %v272_v34  ;;  %v311_v48 = vmul.f32 %v3119_v45, %v272_v34  ;;  %v281_v58 = vmul.f32 %v272_v34, %v3131_v52 }
 0x221   :  { %v276_v38 = vpop.f32.mrb[2].mxu0 }
 0x222   :  { %325 = vrot.lane.b32.xlu1 %v321_v36, %s2839_s20  ;;  %v278_v39 = vpop.f32.mrb[3].mxu0  ;;  %v292_v40 = vmul.f32 %v3104_v37, %v276_v38  ;;  %v322_v42 = vmul.f32 %v3101_v33, %v276_v38  ;;  %v312_v49 = vmul.f32 %v3121_v46, %v276_v38  ;;  %v282_v56 = vmul.f32 %v276_v38, %v3129_v50 }
 0x223   :  { %v3108_v41 = vpack.c.bf16 %v278_v39, %v274_v35 }
 0x224   :  { %297 = vrot.lane.b32.xlu0 %v292_v40, %s2839_s20 }
 0x225   :  { %2250 = vmatpush3.bf16.msra.mxu0 %v3108_v41 }
 0x226   :  { %327 = vrot.lane.b32.xlu1 %v322_v42, %s2839_s20  ;;  %2261 = vmatprep.subr.bf16.mxu0 %v2841_v31 }
 0x22a   :  { %295 = vrot.lane.b32.xlu1 %v291_v44, %s2839_s20 }
 0x294   :  { %v326_v47 = vpop.permute.xlu1 %325 }
 0x295   :  { %v331_v53 = vadd.f32 %v326_v47, %v311_v48 }
 0x296   :  { %v298_v55 = vpop.permute.xlu0 %297 }
 0x297   :  { %v302_v60 = vadd.f32 %v298_v55, %v282_v56 }
 0x298   :  { %v328_v51 = vpop.permute.xlu1 %327 }
 0x299   :  { %v332_v54 = vadd.f32 %v328_v51, %v312_v49 }
 0x29b   :  { %v334_v57 = vpack.c.bf16 %v332_v54, %v331_v53 }
 0x29c   :  { %v296_v59 = vpop.permute.xlu1 %295 }
 0x29d   :  { %v301_v61 = vadd.f32 %v296_v59, %v281_v58  ;;  %458 = vrot.lane.b32.xlu0 %v334_v57, %s2843_s3  ;;  %337 = vrot.lane.b32.xlu1 %v334_v57, %s2836_s6 }
 0x29f   :  { %v333_v62 = vpack.c.bf16 %v302_v60, %v301_v61 }
 0x2a1   :  { %580 = vrot.lane.b32.xlu0 %v334_v57, %s2844_s16  ;;  %456 = vrot.lane.b32.xlu1 %v333_v62, %s2845_s21 }
 0x2a5   :  { %701 = vrot.lane.b32.xlu0 %v334_v57, %s2846_s2  ;;  %578 = vrot.lane.b32.xlu1 %v333_v62, %s2847_s18 }
 0x2a9   :  { %699 = vrot.lane.b32.xlu1 %v333_v62, %s2848_s1 }
 0x30f   :  { %v338_v63 = vpop.permute.xlu1 %337  ;;  %v459_v3 = vpop.permute.xlu0 %458 }
 0x310   :  { %v344_v2 = vsel %vm339_vm2, %v338_v63, 0  ;;  %v464_v4 = vsel %vm339_vm2, %v459_v3, 0 }
 0x311   :  { %2244 = vmatpush3.bf16.xpose.msra.mxu1 %v344_v2 }
 0x312   :  { %2255 = vmatprep.subr.bf16.mxu1 %v2841_v31 }
 0x313   :  { %v581_v5 = vpop.permute.xlu0 %580  ;;  %v457_v6 = vpop.permute.xlu1 %456 }
 0x314   :  { %v586_v7 = vsel %vm339_vm2, %v581_v5, 0 }
 0x317   :  { %v702_v8 = vpop.permute.xlu0 %701  ;;  %v579_v10 = vpop.permute.xlu1 %578 }
 0x318   :  { %2246 = vmatmul.mubr.msk.bf16.vlgmr.msra.gmra.mrb[0].mxu1 %vm339_vm2, %v333_v62  ;;  %v707_v11 = vsel %vm339_vm2, %v702_v8, 0 }
 0x319   :  { %2256 = vmatpush3.bf16.xpose.msra.mxu1 %v464_v4  ;;  %2257 = vmatprep.mubr.msk.bf16.mxu1 %vm2842_vm1, %v2841_v31 }
 0x31a   :  { %2267 = vmatprep.subr.bf16.mxu1 %v2841_v31 }
 0x31b   :  { %v700_v12 = vpop.permute.xlu1 %699 }
 0x320   :  { %2258 = vmatmul.mubr.msk.bf16.vlgmr.msra.gmra.mrb[4].mxu1 %vm339_vm2, %v457_v6 }
 0x321   :  { %2268 = vmatpush3.bf16.xpose.msra.mxu1 %v586_v7  ;;  %2269 = vmatprep.mubr.msk.bf16.mxu1 %vm2842_vm1, %v2841_v31 }
 0x322   :  { %2279 = vmatprep.subr.bf16.mxu1 %v2841_v31 }
 0x328   :  { %2270 = vmatmul.mubr.msk.bf16.vlgmr.msra.gmra.mrb[8].mxu1 %vm339_vm2, %v579_v10 }
 0x329   :  { %2280 = vmatpush3.bf16.xpose.msra.mxu1 %v707_v11  ;;  %2281 = vmatprep.mubr.msk.bf16.mxu1 %vm2842_vm1, %v2841_v31 }
 0x32a   :  { %2291 = vmatprep.subr.bf16.mxu1 %v2841_v31 }
 0x330   :  { %2282 = vmatmul.mubr.msk.bf16.vlgmr.msra.gmra.mrb[12].mxu1 %vm339_vm2, %v700_v12 }
 0x331   :  { %2295 = vmatprep.mubr.msk.bf16.mxu1 %vm2842_vm1, %v2841_v31 }
 0x3eb   :  { %v380_v14 = vpop.f32.mrb[0].mxu1 }
 0x3ec   :  { %v381_v16 = vadd.f32 %v380_v14, %v3162_v13  ;;  %v2247_v17 = vpop.f32.mrb[1].mxu1 }
 0x3ed   :  { %v383_v18 = vpop.f32.mrb[2].mxu1 }
 0x3ee   :  { %v384_v19 = vadd.f32 %v383_v18, %v3164_v15  ;;  %v2248_v20 = vpop.f32.mrb[3].mxu1  ;;  %v388_v21 = vsel %vm387_vm3, %v381_v16, -inf }
 0x3ef   :  { %389 = vmax.xlane.f32.xlu0 %v388_v21 }
 0x3f0   :  { %v391_v22 = vsel %vm387_vm3, %v384_v19, -inf }
 0x3f1   :  { %392 = vmax.xlane.f32.xlu1 %v391_v22 }
 0x3f3   :  { %v500_v23 = vpop.f32.mrb[4].mxu1 }
 0x3f4   :  { %v3171_v24 = vadd.f32 %v500_v23, %v3162_v13  ;;  %v2259_v25 = vpop.f32.mrb[5].mxu1 }
 0x3f5   :  { %v503_v26 = vpop.f32.mrb[6].mxu1 }
 0x3f6   :  { %v504_v27 = vadd.f32 %v503_v26, %v3164_v15  ;;  %v2260_v28 = vpop.f32.mrb[7].mxu1  ;;  %v507_v29 = vsel %vm387_vm3, %v3171_v24, -inf }
 0x3f7   :  { %508 = vmax.xlane.f32.xlu0 %v507_v29 }
 0x3f8   :  { %v510_v30 = vsel %vm387_vm3, %v504_v27, -inf }
 0x3fb   :  { %511 = vmax.xlane.f32.xlu0 %v510_v30  ;;  %v622_v34 = vpop.f32.mrb[8].mxu1 }
 0x3fc   :  { %v623_v35 = vadd.f32 %v622_v34, %v3162_v13  ;;  %v2271_v36 = vpop.f32.mrb[9].mxu1 }
 0x3fd   :  { %v625_v38 = vpop.f32.mrb[10].mxu1 }
 0x3fe   :  { %v626_v39 = vadd.f32 %v625_v38, %v3164_v15  ;;  %v2272_v40 = vpop.f32.mrb[11].mxu1  ;;  %v629_v42 = vsel %vm387_vm3, %v623_v35, -inf }
 0x3ff   :  { %630 = vmax.xlane.f32.xlu1 %v629_v42 }
 0x400   :  { %v632_v44 = vsel %vm387_vm3, %v626_v39, -inf }
 0x401   :  { %633 = vmax.xlane.f32.xlu0 %v632_v44 }
 0x403   :  { %v743_v47 = vpop.f32.mrb[12].mxu1 }
 0x404   :  { %v744_v48 = vadd.f32 %v743_v47, %v3162_v13  ;;  %v2283_v49 = vpop.f32.mrb[13].mxu1 }
 0x405   :  { %v746_v51 = vpop.f32.mrb[14].mxu1 }
 0x406   :  { %v747_v53 = vadd.f32 %v746_v51, %v3164_v15  ;;  %v2284_v54 = vpop.f32.mrb[15].mxu1  ;;  %v750_v55 = vsel %vm387_vm3, %v744_v48, -inf }
 0x407   :  { %751 = vmax.xlane.f32.xlu1 %v750_v55 }
 0x408   :  { %v753_v56 = vsel %vm387_vm3, %v747_v53, -inf }
 0x409   :  { %754 = vmax.xlane.f32.xlu0 %v753_v56 }
 0x47c   :  { %v390_v57 = vpop.xlane.xlu0 %389 }
 0x47d   :  { %v394_v58 = vsub.f32 %v381_v16, %v390_v57 }
 0x47e   :  { %v393_v59 = vpop.xlane.xlu1 %392 }
 0x47f   :  { %v396_v60 = vmul.f32 1.442695, %v394_v58  ;;  %v395_v61 = vsub.f32 %v384_v19, %v393_v59 }
 0x481   :  { %2495 = vpow2.f32 %v396_v60  ;;  %v398_v62 = vmul.f32 1.442695, %v395_v61 }
 0x483   :  { %2497 = vpow2.f32 %v398_v62 }
 0x484   :  { %v509_v63 = vpop.xlane.xlu0 %508 }
 0x485   :  { %v513_v25 = vsub.f32 %v3171_v24, %v509_v63 }
 0x488   :  { %v512_v2 = vpop.xlane.xlu0 %511 }
 0x489   :  { %v514_v3 = vsub.f32 %v504_v27, %v512_v2  ;;  %v515_v27 = vmul.f32 1.442695, %v513_v25 }
 0x48b   :  { %v2496_v4 = vpop.eup %2495  ;;  %v517_v5 = vmul.f32 1.442695, %v514_v3 }
 0x48c   :  { %v400_v6 = vsel %vm387_vm3, %v2496_v4, 0.0  ;;  %v631_v26 = vpop.xlane.xlu1 %630 }
 0x48d   :  { %v2498_v7 = vpop.eup %2497  ;;  %2499 = vpow2.f32 %v517_v5  ;;  %401 = vadd.xlane.f32.xlu1 %v400_v6  ;;  %v635_v28 = vsub.f32 %v623_v35, %v631_v26 }
 0x48e   :  { %v634_v8 = vpop.xlane.xlu0 %633  ;;  %v403_v10 = vsel %vm387_vm3, %v2498_v7, 0.0 }
 0x48f   :  { %v636_v11 = vsub.f32 %v626_v39, %v634_v8  ;;  %404 = vadd.xlane.f32.xlu0 %v403_v10  ;;  %v637_v30 = vmul.f32 1.442695, %v635_v28  ;;  %v2467_v28 = vld [vmem:[%s3494_s8] sm:$0xff]  }
 0x490   :  { %2292 = vmatpush3.bf16.msra.mxu1 %v2467_v28 }
 0x491   :  { %v639_v12 = vmul.f32 1.442695, %v636_v11  ;;  %2293 = vmatprep.subr.bf16.mxu1 %v2841_v31 }
 0x493   :  { %2501 = vpow2.f32 %v639_v12 }
 0x494   :  { %v752_v29 = vpop.xlane.xlu1 %751 }
 0x495   :  { %v756_v34 = vsub.f32 %v744_v48, %v752_v29 }
 0x496   :  { %v755_v14 = vpop.xlane.xlu0 %754 }
 0x497   :  { %v2500_v16 = vpop.eup %2499  ;;  %v757_v17 = vsub.f32 %v747_v53, %v755_v14  ;;  %v758_v36 = vmul.f32 1.442695, %v756_v34 }
 0x498   :  { %v522_v18 = vsel %vm387_vm3, %v2500_v16, 0.0 }
 0x499   :  { %v760_v19 = vmul.f32 1.442695, %v757_v17  ;;  %523 = vadd.xlane.f32.xlu0 %v522_v18 }
 0x49b   :  { %2503 = vpow2.f32 %v760_v19 }
 0x49c   :  { %2505 = vpow2.f32 %v515_v27 }
 0x49d   :  { %v3188_v20 = vpop.eup %2501  ;;  %2507 = vpow2.f32 %v637_v30 }
 0x49e   :  { %531 = vrot.lane.b32.xlu1 %v3108_v41, %s2845_s21  ;;  %v644_v21 = vsel %vm387_vm3, %v3188_v20, 0.0  ;;  %2509 = vpow2.f32 %v758_v36  ;;  %v2468_v36 = vld [vmem:[%s3494_s8 + $0x8] sm:$0xff]  }
 0x49f   :  { %645 = vadd.xlane.f32.xlu0 %v644_v21  ;;  %2294 = vmatpush3.bf16.msra.mxu1 %v2468_v36  ;;  %v2472_v36 = vld [vmem:[%s3497_s11 + $0x8] sm:$0xff]  }
 0x4a0   :  { %2307 = vmatprep.subr.bf16.mxu1 %v2841_v31 }
 0x4a5   :  { %v3194_v22 = vpop.eup %2503 }
 0x4a6   :  { %v765_v23 = vsel %vm387_vm3, %v3194_v22, 0.0  ;;  %v2506_v38 = vpop.eup %2505 }
 0x4a7   :  { %766 = vadd.xlane.f32.xlu0 %v765_v23  ;;  %v519_v39 = vsel %vm387_vm3, %v2506_v38, 0.0  ;;  %v2508_v40 = vpop.eup %2507 }
 0x4a8   :  { %v641_v24 = vsel %vm387_vm3, %v2508_v40, 0.0  ;;  %v2510_v42 = vpop.eup %2509 }
 0x4a9   :  { %v762_v35 = vsel %vm387_vm3, %v2510_v42, 0.0 }
 0x4bd   :  { %652 = vrot.lane.b32.xlu0 %v3108_v41, %s2847_s18 }
 0x4c2   :  { %520 = vadd.xlane.f32.xlu1 %v519_v39 }
 0x4c6   :  { %642 = vadd.xlane.f32.xlu1 %v641_v24 }
 0x4ca   :  { %763 = vadd.xlane.f32.xlu1 %v762_v35 }
 0x4db   :  { %773 = vrot.lane.b32.xlu1 %v3108_v41, %s2848_s1 }
 0x51a   :  { %v402_v44 = vpop.xlane.xlu1 %401 }
 0x51b   :  { %2511 = vrcp.f32 %v402_v44 }
 0x51c   :  { %v405_v47 = vpop.xlane.xlu0 %404 }
 0x51d   :  { %2513 = vrcp.f32 %v405_v47 }
 0x51e   :  { %v532_v55 = vpop.permute.xlu1 %531 }
 0x525   :  { %v2512_v48 = vpop.eup %2511 }
 0x526   :  { %v408_v51 = vmul.f32 %v2512_v48, %v2496_v4  ;;  %v524_v56 = vpop.xlane.xlu0 %523 }
 0x527   :  { %v2514_v49 = vpop.eup %2513  ;;  %2515 = vrcp.f32 %v524_v56 }
 0x528   :  { %v409_v53 = vmul.f32 %v2514_v49, %v2498_v7 }
 0x52a   :  { %v410_v54 = vpack.c.bf16 %v409_v53, %v408_v51 }
 0x52c   :  { %2252 = vmatmul.mubr.msk.bf16.vlgmr.msra.gmra.mrb[4].mxu0 %vm387_vm3, %v410_v54  ;;  %v646_v57 = vpop.xlane.xlu0 %645 }
 0x52d   :  { %2262 = vmatpush3.bf16.msra.mxu0 %v532_v55  ;;  %2263 = vmatprep.mubr.msk.bf16.mxu0 %vm2842_vm1, %v2841_v31 }
 0x52e   :  { %2273 = vmatprep.subr.bf16.mxu0 %v2841_v31 }
 0x531   :  { %v2516_v59 = vpop.eup %2515 }
 0x532   :  { %v528_v63 = vmul.f32 %v2516_v59, %v2500_v16 }
 0x534   :  { %v767_v60 = vpop.xlane.xlu0 %766 }
 0x538   :  { %v653_v5 = vpop.permute.xlu0 %652 }
 0x54f   :  { %v521_v41 = vpop.xlane.xlu1 %520 }
 0x550   :  { %2517 = vrcp.f32 %v521_v41 }
 0x553   :  { %v643_v58 = vpop.xlane.xlu1 %642 }
 0x554   :  { %2519 = vrcp.f32 %v643_v58 }
 0x555   :  { %2521 = vrcp.f32 %v646_v57 }
 0x557   :  { %v764_v61 = vpop.xlane.xlu1 %763 }
 0x558   :  { %2523 = vrcp.f32 %v764_v61 }
 0x559   :  { %2525 = vrcp.f32 %v767_v60 }
 0x55a   :  { %v2518_v62 = vpop.eup %2517 }
 0x55b   :  { %v527_v2 = vmul.f32 %v2518_v62, %v2506_v38  ;;  %v774_v12 = vpop.permute.xlu1 %773 }
 0x55d   :  { %v529_v3 = vpack.c.bf16 %v528_v63, %v527_v2 }
 0x55e   :  { %v2520_v4 = vpop.eup %2519 }
 0x55f   :  { %2264 = vmatmul.mubr.msk.bf16.vlgmr.msra.gmra.mrb[8].mxu0 %vm387_vm3, %v529_v3  ;;  %v2522_v6 = vpop.eup %2521  ;;  %v649_v7 = vmul.f32 %v2520_v4, %v2508_v40 }
 0x560   :  { %2274 = vmatpush3.bf16.msra.mxu0 %v653_v5  ;;  %2275 = vmatprep.mubr.msk.bf16.mxu0 %vm2842_vm1, %v2841_v31  ;;  %v650_v8 = vmul.f32 %v2522_v6, %v3188_v20 }
 0x561   :  { %2285 = vmatprep.subr.bf16.mxu0 %v2841_v31 }
 0x562   :  { %v651_v10 = vpack.c.bf16 %v650_v8, %v649_v7  ;;  %v2524_v11 = vpop.eup %2523 }
 0x563   :  { %v2526_v14 = vpop.eup %2525  ;;  %v770_v16 = vmul.f32 %v2524_v11, %v2510_v42 }
 0x564   :  { %v771_v17 = vmul.f32 %v2526_v14, %v3194_v22 }
 0x566   :  { %v772_v18 = vpack.c.bf16 %v771_v17, %v770_v16  ;;  %v2470_v16 = vld [vmem:[#allocation16 + $0x8] sm:$0xff]  }
 0x567   :  { %2276 = vmatmul.mubr.msk.bf16.vlgmr.msra.gmra.mrb[12].mxu0 %vm387_vm3, %v651_v10 }
 0x568   :  { %2286 = vmatpush3.bf16.msra.mxu0 %v774_v12  ;;  %2287 = vmatprep.mubr.msk.bf16.mxu0 %vm2842_vm1, %v2841_v31 }
 0x569   :  { %2299 = vmatprep.subr.bf16.mxu0 %v2841_v31 }
 0x56f   :  { %2288 = vmatmul.mubr.msk.bf16.vlgmr.msra.gmra.mrb[16].mxu0 %vm387_vm3, %v772_v18 }
 0x570   :  { %2303 = vmatprep.mubr.msk.bf16.mxu0 %vm2842_vm1, %v2841_v31 }
 0x5ff   :  { %v448_v19 = vpop.f32.mrb[4].mxu0 }
 0x600   :  { %v2253_v20 = vpop.f32.mrb[5].mxu0 }
 0x601   :  { %v451_v21 = vpop.f32.mrb[6].mxu0 }
 0x602   :  { %v2254_v23 = vpop.f32.mrb[7].mxu0 }
 0x632   :  { %v571_v25 = vpop.f32.mrb[8].mxu0 }
 0x633   :  { %v2265_v26 = vpop.f32.mrb[9].mxu0 }
 0x634   :  { %v574_v27 = vpop.f32.mrb[10].mxu0 }
 0x635   :  { %v2431_v29 = vpack.i.bf16 %v574_v27, %v571_v25  ;;  %v2266_v30 = vpop.f32.mrb[11].mxu0  ;;  %v2127_v27 = vld [vmem:[#allocation14] ss:$0 sm:$0xff] }
 0x637   :  { %2432 = vrot.lane.b32.xlu1 %v2431_v29, %s2826_s26 }
 0x63a   :  { %v692_v22 = vpop.f32.mrb[12].mxu0 }
 0x63b   :  { %v2277_v34 = vpop.f32.mrb[13].mxu0 }
 0x63c   :  { %v695_v38 = vpop.f32.mrb[14].mxu0  ;;  %v2471_v34 = vld [vmem:[%s3497_s11] sm:$0xff]  }
 0x63d   :  { %v2436_v39 = vpack.i.bf16 %v695_v38, %v692_v22  ;;  %v2278_v40 = vpop.f32.mrb[15].mxu0  ;;  %v2473_v38 = vld [vmem:[%s3497_s11 + $0x10] sm:$0xff]  }
 0x63f   :  { %2437 = vrot.lane.b32.xlu0 %v2436_v39, %s2830_s24 }
 0x642   :  { %v813_v24 = vpop.f32.mrb[16].mxu0 }
 0x643   :  { %v2289_v42 = vpop.f32.mrb[17].mxu0 }
 0x644   :  { %v816_v35 = vpop.f32.mrb[18].mxu0 }
 0x645   :  { %v2441_v44 = vpack.i.bf16 %v816_v35, %v813_v24  ;;  %v2290_v47 = vpop.f32.mrb[19].mxu0 }
 0x647   :  { %2442 = vrot.lane.b32.xlu1 %v2441_v44, %s2849_s30 }
 0x6a9   :  { %v2433_v48 = vpop.permute.xlu1 %2432 }
 0x6aa   :  { %v2435_v51 = vunpack.i.h.bf16 %v2433_v48  ;;  %v2434_v53 = vunpack.i.l.bf16 %v2433_v48 }
 0x6ac   :  { %v845_v41 = vsel %vm339_vm2, %v451_v21, %v2435_v51  ;;  %v844_v57 = vsel %vm339_vm2, %v448_v19, %v2434_v53 }
 0x6b1   :  { %v2438_v49 = vpop.permute.xlu0 %2437 }
 0x6b2   :  { %v2440_v54 = vunpack.i.h.bf16 %v2438_v49  ;;  %v2439_v55 = vunpack.i.l.bf16 %v2438_v49 }
 0x6b4   :  { %v847_v60 = vsel %vm387_vm3, %v845_v41, %v2440_v54  ;;  %v846_v61 = vsel %vm387_vm3, %v844_v57, %v2439_v55 }
 0x6b9   :  { %v2443_v56 = vpop.permute.xlu1 %2442 }
 0x6ba   :  { %v2445_v58 = vunpack.i.h.bf16 %v2443_v56  ;;  %v2444_v59 = vunpack.i.l.bf16 %v2443_v56 }
 0x6bc   :  { %v850_v62 = vsel %vm848_vm4, %v847_v60, %v2445_v58  ;;  %v849_v63 = vsel %vm848_vm4, %v846_v61, %v2444_v59 }
 0x6bd   :  { %v851_v2 = vpack.c.bf16 %v850_v62, %v849_v63 }
 0x6bf   :  { %2296 = vmatmul.mubr.msk.bf16.vlgmr.msra.gmra.mrb[16].mxu1 %vm186_vm0, %v851_v2 }
 0x6c0   :  { %2315 = vmatprep.mubr.msk.bf16.mxu1 %vm2842_vm1, %v2841_v31  ;;  %2308 = vmatpush3.bf16.msra.mxu1 %v2471_v34 }
 0x6c1   :  { %2309 = vmatprep.subr.bf16.mxu1 %v2841_v31 }
 0x6c4   :  { %2310 = vmatpush3.bf16.msra.mxu1 %v2472_v36 }
 0x6c5   :  { %2311 = vmatprep.subr.bf16.mxu1 %v2841_v31 }
 0x6c8   :  { %2312 = vmatpush3.bf16.msra.mxu1 %v2473_v38 }
 0x6c9   :  { %2313 = vmatprep.subr.bf16.mxu1 %v2841_v31 }
 0x792   :  { %v905_v3 = vpop.f32.mrb[16].mxu1 }
 0x793   :  { %v3244_v4 = vadd.f32 %v905_v3, %v3067_v0  ;;  %v2297_v5 = vpop.f32.mrb[17].mxu1  ;;  %v2469_v0 = vld [vmem:[#allocation16] sm:$0xff]  }
 0x794   :  { %v908_v6 = vpop.f32.mrb[18].mxu1  ;;  %2300 = vmatpush3.bf16.msra.mxu0 %v2469_v0 }
 0x795   :  { %v3247_v7 = vadd.f32 %v908_v6, %v3069_v1  ;;  %v2298_v8 = vpop.f32.mrb[19].mxu1  ;;  %v915_v10 = vmul.f32 %v3244_v4, %v3244_v4  ;;  %2301 = vmatprep.subr.bf16.mxu0 %v2841_v31 }
 0x797   :  { %v917_v11 = vsel %vm186_vm0, %v915_v10, 0.0  ;;  %v916_v12 = vmul.f32 %v3247_v7, %v3247_v7 }
 0x798   :  { %918 = vadd.xlane.f32.xlu0 %v917_v11  ;;  %2302 = vmatpush3.bf16.msra.mxu0 %v2470_v16 }
 0x799   :  { %v920_v14 = vsel %vm186_vm0, %v916_v12, 0.0  ;;  %v2478_v12 = vld [vmem:[%s3493_s7 + $0x30] ss:$8 sps:$4 sm:$0xff]  }
 0x79a   :  { %921 = vadd.xlane.f32.xlu1 %v920_v14  ;;  %v2480_v14 = vld [vmem:[%s3493_s7 + $0x34] ss:$8 sps:$4 sm:$0xff]  }
 0x825   :  { %v919_v1 = vpop.xlane.xlu0 %918 }
 0x826   :  { %v923_v17 = vmul.f32 0.03125, %v919_v1 }
 0x827   :  { %v922_v18 = vpop.xlane.xlu1 %921 }
 0x828   :  { %v925_v19 = vadd.f32 1e-06, %v923_v17  ;;  %v924_v20 = vmul.f32 0.03125, %v922_v18 }
 0x82a   :  { %2527 = vrsqrt.f32 %v925_v19  ;;  %v926_v21 = vadd.f32 1e-06, %v924_v20 }
 0x82c   :  { %2529 = vrsqrt.f32 %v926_v21 }
 0x834   :  { %v2528_v23 = vpop.eup %2527 }
 0x835   :  { %v929_v25 = vmul.f32 %v2528_v23, %v3244_v4 }
 0x836   :  { %v2530_v26 = vpop.eup %2529 }
 0x837   :  { %v930_v28 = vmul.f32 %v2530_v26, %v3247_v7  ;;  %v937_v29 = vmul.f32 %v2127_v27, %v929_v25  ;;  %v2138_v25 = vld [vmem:[#allocation13 + $0x1] ss:$0 sm:$0xff] }
 0x839   :  { %v938_v30 = vmul.f32 %v2127_v27, %v930_v28 }
 0x83b   :  { %v939_v22 = vpack.c.bf16 %v938_v30, %v937_v29 }
 0x83d   :  { %2304 = vmatmul.mubr.msk.bf16.vlgmr.msra.gmra.mrb[20].mxu0 %vm186_vm0, %v939_v22 }
 0x83e   :  { %1191 = vmatprep.mubr.bf16.mxu0 %v2838_v9  ;;  %v2474_v9 = vld [vmem:[%s3497_s11 + $0x18] sm:$0xff]  }
 0x83f   :  { %2314 = vmatpush3.bf16.msra.mxu1 %v2474_v9 }
 0x840   :  { %2325 = vmatprep.subr.bf16.mxu1 %v2841_v31 }
 0x910   :  { %v993_v39 = vpop.f32.mrb[20].mxu0 }
 0x911   :  { %1016 = vrot.lane.b32.xlu0 %v993_v39, %s2836_s6  ;;  %v2305_v40 = vpop.f32.mrb[21].mxu0  ;;  %v2131_v35 = vmul.f32 -1.442695, %v993_v39 }
 0x912   :  { %v996_v24 = vpop.f32.mrb[22].mxu0 }
 0x913   :  { %1018 = vrot.lane.b32.xlu1 %v996_v24, %s2836_s6  ;;  %v2306_v42 = vpop.f32.mrb[23].mxu0  ;;  %v2132_v44 = vmul.f32 -1.442695, %v996_v24  ;;  %2531 = vpow2.f32 %v2131_v35 }
 0x915   :  { %2533 = vpow2.f32 %v2132_v44 }
 0x91d   :  { %v2532_v47 = vpop.eup %2531 }
 0x91e   :  { %v1006_v49 = vadd.f32 1.0, %v2532_v47 }
 0x91f   :  { %v2534_v48 = vpop.eup %2533 }
 0x920   :  { %v1007_v51 = vadd.f32 1.0, %v2534_v48  ;;  %2535 = vrcp.f32 %v1006_v49 }
 0x922   :  { %2537 = vrcp.f32 %v1007_v51 }
 0x92a   :  { %v2536_v53 = vpop.eup %2535 }
 0x92b   :  { %v1012_v56 = vmul.f32 %v2536_v53, %v993_v39 }
 0x92c   :  { %v2538_v54 = vpop.eup %2537 }
 0x92d   :  { %v1013_v41 = vmul.f32 %v2538_v54, %v996_v24 }
 0x983   :  { %v1017_v55 = vpop.permute.xlu0 %1016 }
 0x984   :  { %v1022_v58 = vmul.f32 %v1017_v55, %v1012_v56 }
 0x985   :  { %v1019_v57 = vpop.permute.xlu1 %1018 }
 0x986   :  { %v1023_v59 = vmul.f32 %v1019_v57, %v1013_v41 }
 0x988   :  { %v1024_v60 = vpack.c.bf16 %v1023_v59, %v1022_v58 }
 0x98a   :  { %2316 = vmatmul.mubr.msk.bf16.vlgmr.msra.gmra.mrb[20].mxu1 %vm1057_vm5, %v1024_v60 }
 0x98b   :  { %2327 = vmatprep.mubr.msk.bf16.mxu1 %vm2842_vm1, %v2841_v31 }
 0xa5d   :  { %v1095_v61 = vpop.f32.mrb[20].mxu1 }
 0xa5e   :  { %v3282_v62 = vadd.f32 %v1095_v61, %v3244_v4  ;;  %v2317_v63 = vpop.f32.mrb[21].mxu1  ;;  %v2477_v4 = vld [vmem:[%s3493_s7 + $0x24] ss:$8 sps:$4 sm:$0xff]  }
 0xa5f   :  { %v1098_v2 = vpop.f32.mrb[22].mxu1  ;;  %1159 = vmatprep.subr.bf16.mxu0 %v2477_v4 }
 0xa60   :  { %v3285_v3 = vadd.f32 %v1098_v2, %v3247_v7  ;;  %v2318_v5 = vpop.f32.mrb[23].mxu1  ;;  %v1106_v6 = vmul.f32 %v3282_v62, %v3282_v62  ;;  %v2475_v7 = vld [vmem:[%s3493_s7 + $0x20] ss:$8 sps:$4 sm:$0xff]  }
 0xa61   :  { %1160 = vmatpush1.bf16.msra.mxu0 %v2475_v7 }
 0xa62   :  { %v1108_v8 = vsel %vm186_vm0, %v1106_v6, 0.0  ;;  %v1107_v10 = vmul.f32 %v3285_v3, %v3285_v3  ;;  %1161 = vmatprep.subr.bf16.mxu0 %v2480_v14 }
 0xa63   :  { %1109 = vadd.xlane.f32.xlu0 %v1108_v8 }
 0xa64   :  { %v1111_v11 = vsel %vm186_vm0, %v1107_v10, 0.0 }
 0xa65   :  { %1112 = vadd.xlane.f32.xlu1 %v1111_v11  ;;  %1162 = vmatpush1.bf16.msra.mxu0 %v2478_v12 }
 0xa66   :  { %2319 = vmatprep.subr.bf16.mxu0 %v2841_v31 }
 0xaf0   :  { %v1110_v0 = vpop.xlane.xlu0 %1109 }
 0xaf1   :  { %v1114_v16 = vmul.f32 0.03125, %v1110_v0 }
 0xaf2   :  { %v1113_v1 = vpop.xlane.xlu1 %1112 }
 0xaf3   :  { %v1116_v17 = vadd.f32 1e-06, %v1114_v16  ;;  %v1115_v18 = vmul.f32 0.03125, %v1113_v1 }
 0xaf5   :  { %2539 = vrsqrt.f32 %v1116_v17  ;;  %v1117_v19 = vadd.f32 1e-06, %v1115_v18 }
 0xaf7   :  { %2541 = vrsqrt.f32 %v1117_v19 }
 0xaff   :  { %v2540_v20 = vpop.eup %2539 }
 0xb00   :  { %v1120_v21 = vmul.f32 %v2540_v20, %v3282_v62 }
 0xb01   :  { %v2542_v23 = vpop.eup %2541 }
 0xb02   :  { %v1121_v26 = vmul.f32 %v2542_v23, %v3285_v3  ;;  %v1128_v27 = vmul.f32 %v2138_v25, %v1120_v21 }
 0xb04   :  { %v1129_v28 = vmul.f32 %v2138_v25, %v1121_v26 }
 0xb06   :  { %v1130_v29 = vpack.c.bf16 %v1129_v28, %v1128_v27 }
 0xb08   :  { %2147 = vmatmul.mubr.msk.bf16.vlgmr.msra.gmra.mrb[24].mxu0 %vm186_vm0, %v1130_v29 }
 0xb09   :  { %2321 = vmatprep.mubr.msk.bf16.mxu0 %vm2842_vm1, %v2841_v31 }
 0xbdb   :  { %v1193_v30 = vpop.f32.mrb[24].mxu0 }
 0xbdc   :  { %v1195_v22 = vpop.f32.mrb[25].mxu0  ;;  %v1218_v34 = vmul.f32 %v1193_v30, %v3099_v32  ;;  %v1204_v40 = vmul.f32 %v1193_v30, %v3112_v43  ;;  %v1216_v42 = vmul.f32 %v1193_v30, %v3119_v45  ;;  %v1202_v49 = vmul.f32 %v1193_v30, %v3131_v52 }
 0xbdd   :  { %v1197_v36 = vpop.f32.mrb[26].mxu0 }
 0xbde   :  { %1222 = vrot.lane.b32.xlu0 %v1218_v34, %s2839_s20  ;;  %v1199_v38 = vpop.f32.mrb[27].mxu0  ;;  %v1219_v9 = vmul.f32 %v1197_v36, %v3101_v33  ;;  %v1205_v24 = vmul.f32 %v1197_v36, %v3104_v37  ;;  %v1217_v33 = vmul.f32 %v1197_v36, %v3121_v46  ;;  %v1203_v51 = vmul.f32 %v1197_v36, %v3129_v50 }
 0xbdf   :  { %v3314_v39 = vpack.c.bf16 %v1199_v38, %v1195_v22 }
 0xbe0   :  { %1224 = vrot.lane.b32.xlu1 %v1219_v9, %s2839_s20 }
 0xbe1   :  { %2326 = vmatpush3.bf16.msra.mxu1 %v3314_v39 }
 0xbe2   :  { %1208 = vrot.lane.b32.xlu0 %v1204_v40, %s2839_s20  ;;  %2337 = vmatprep.subr.bf16.mxu1 %v2841_v31 }
 0xbe4   :  { %1210 = vrot.lane.b32.xlu1 %v1205_v24, %s2839_s20 }
 0xc50   :  { %v1223_v32 = vpop.permute.xlu0 %1222 }
 0xc51   :  { %v1228_v44 = vadd.f32 %v1223_v32, %v1216_v42 }
 0xc52   :  { %v1225_v35 = vpop.permute.xlu1 %1224 }
 0xc53   :  { %v1229_v47 = vadd.f32 %v1225_v35, %v1217_v33 }
 0xc54   :  { %v1209_v48 = vpop.permute.xlu0 %1208 }
 0xc55   :  { %v1231_v43 = vpack.c.bf16 %v1229_v47, %v1228_v44  ;;  %v1214_v37 = vadd.f32 %v1209_v48, %v1202_v49 }
 0xc56   :  { %v1211_v53 = vpop.permute.xlu1 %1210 }
 0xc57   :  { %v1215_v54 = vadd.f32 %v1211_v53, %v1203_v51  ;;  %1234 = vrot.lane.b32.xlu0 %v1231_v43, %s2836_s6  ;;  %1353 = vrot.lane.b32.xlu1 %v1231_v43, %s2843_s3 }
 0xc59   :  { %v1230_v55 = vpack.c.bf16 %v1215_v54, %v1214_v37 }
 0xc5b   :  { %1475 = vrot.lane.b32.xlu1 %v1231_v43, %s2844_s16  ;;  %1351 = vrot.lane.b32.xlu0 %v1230_v55, %s2845_s21 }
 0xc5f   :  { %1596 = vrot.lane.b32.xlu1 %v1231_v43, %s2846_s2  ;;  %1473 = vrot.lane.b32.xlu0 %v1230_v55, %s2847_s18 }
 0xc63   :  { %1594 = vrot.lane.b32.xlu0 %v1230_v55, %s2848_s1 }
 0xcc9   :  { %v1235_v45 = vpop.permute.xlu0 %1234  ;;  %v1354_v50 = vpop.permute.xlu1 %1353 }
 0xcca   :  { %v1240_v46 = vsel %vm339_vm2, %v1235_v45, 0  ;;  %v1359_v52 = vsel %vm339_vm2, %v1354_v50, 0 }
 0xccb   :  { %2320 = vmatpush3.bf16.xpose.msra.mxu0 %v1240_v46 }
 0xccc   :  { %2331 = vmatprep.subr.bf16.mxu0 %v2841_v31 }
 0xccd   :  { %v1476_v56 = vpop.permute.xlu1 %1475  ;;  %v1352_v41 = vpop.permute.xlu0 %1351 }
 0xcce   :  { %v1481_v57 = vsel %vm339_vm2, %v1476_v56, 0 }
 0xcd1   :  { %v1597_v58 = vpop.permute.xlu1 %1596  ;;  %v1474_v59 = vpop.permute.xlu0 %1473 }
 0xcd2   :  { %2322 = vmatmul.mubr.msk.bf16.vlgmr.msra.gmra.mrb[28].mxu0 %vm339_vm2, %v1230_v55  ;;  %v1602_v60 = vsel %vm339_vm2, %v1597_v58, 0 }
 0xcd3   :  { %2332 = vmatpush3.bf16.xpose.msra.mxu0 %v1359_v52  ;;  %2333 = vmatprep.mubr.msk.bf16.mxu0 %vm2842_vm1, %v2841_v31 }
 0xcd4   :  { %2343 = vmatprep.subr.bf16.mxu0 %v2841_v31 }
 0xcd5   :  { %v1595_v61 = vpop.permute.xlu0 %1594 }
 0xcda   :  { %2334 = vmatmul.mubr.msk.bf16.vlgmr.msra.gmra.mrb[32].mxu0 %vm339_vm2, %v1352_v41 }
 0xcdb   :  { %2344 = vmatpush3.bf16.xpose.msra.mxu0 %v1481_v57  ;;  %2345 = vmatprep.mubr.msk.bf16.mxu0 %vm2842_vm1, %v2841_v31 }
 0xcdc   :  { %2355 = vmatprep.subr.bf16.mxu0 %v2841_v31 }
 0xce2   :  { %2346 = vmatmul.mubr.msk.bf16.vlgmr.msra.gmra.mrb[36].mxu0 %vm339_vm2, %v1474_v59 }
 0xce3   :  { %2356 = vmatpush3.bf16.xpose.msra.mxu0 %v1602_v60  ;;  %2357 = vmatprep.mubr.msk.bf16.mxu0 %vm2842_vm1, %v2841_v31 }
 0xce4   :  { %2367 = vmatprep.subr.bf16.mxu0 %v2841_v31 }
 0xcea   :  { %2358 = vmatmul.mubr.msk.bf16.vlgmr.msra.gmra.mrb[40].mxu0 %vm339_vm2, %v1595_v61 }
 0xceb   :  { %2371 = vmatprep.mubr.msk.bf16.mxu0 %vm2842_vm1, %v2841_v31 }
 0xda5   :  { %v1276_v63 = vpop.f32.mrb[28].mxu0 }
 0xda6   :  { %v1277_v2 = vadd.f32 %v1276_v63, %v3162_v13  ;;  %v2323_v5 = vpop.f32.mrb[29].mxu0 }
 0xda7   :  { %v1279_v6 = vpop.f32.mrb[30].mxu0 }
 0xda8   :  { %v1280_v8 = vadd.f32 %v1279_v6, %v3164_v15  ;;  %v2324_v10 = vpop.f32.mrb[31].mxu0  ;;  %v1283_v11 = vsel %vm387_vm3, %v1277_v2, -inf }
 0xda9   :  { %1284 = vmax.xlane.f32.xlu1 %v1283_v11 }
 0xdaa   :  { %v1286_v4 = vsel %vm387_vm3, %v1280_v8, -inf }
 0xdab   :  { %1287 = vmax.xlane.f32.xlu0 %v1286_v4 }
 0xdad   :  { %v1395_v7 = vpop.f32.mrb[32].mxu0 }
 0xdae   :  { %v1396_v12 = vadd.f32 %v1395_v7, %v3162_v13  ;;  %v2335_v14 = vpop.f32.mrb[33].mxu0 }
 0xdaf   :  { %v1398_v0 = vpop.f32.mrb[34].mxu0 }
 0xdb0   :  { %v1399_v16 = vadd.f32 %v1398_v0, %v3164_v15  ;;  %v2336_v1 = vpop.f32.mrb[35].mxu0  ;;  %v1402_v17 = vsel %vm387_vm3, %v1396_v12, -inf }
 0xdb1   :  { %1403 = vmax.xlane.f32.xlu0 %v1402_v17 }
 0xdb2   :  { %v1405_v18 = vsel %vm387_vm3, %v1399_v16, -inf }
 0xdb3   :  { %1406 = vmax.xlane.f32.xlu1 %v1405_v18 }
 0xdb5   :  { %v1517_v19 = vpop.f32.mrb[36].mxu0 }
 0xdb6   :  { %v1518_v20 = vadd.f32 %v1517_v19, %v3162_v13  ;;  %v2347_v21 = vpop.f32.mrb[37].mxu0 }
 0xdb7   :  { %v1520_v23 = vpop.f32.mrb[38].mxu0 }
 0xdb8   :  { %v1521_v25 = vadd.f32 %v1520_v23, %v3164_v15  ;;  %v2348_v26 = vpop.f32.mrb[39].mxu0  ;;  %v1524_v27 = vsel %vm387_vm3, %v1518_v20, -inf }
 0xdb9   :  { %1525 = vmax.xlane.f32.xlu0 %v1524_v27 }
 0xdba   :  { %v1527_v28 = vsel %vm387_vm3, %v1521_v25, -inf }
 0xdbb   :  { %1528 = vmax.xlane.f32.xlu1 %v1527_v28 }
 0xdbd   :  { %v1638_v29 = vpop.f32.mrb[40].mxu0 }
 0xdbe   :  { %v1639_v30 = vadd.f32 %v1638_v29, %v3162_v13  ;;  %v2359_v22 = vpop.f32.mrb[41].mxu0 }
 0xdbf   :  { %v1641_v34 = vpop.f32.mrb[42].mxu0 }
 0xdc0   :  { %v1642_v36 = vadd.f32 %v1641_v34, %v3164_v15  ;;  %v2360_v38 = vpop.f32.mrb[43].mxu0  ;;  %v1645_v9 = vsel %vm387_vm3, %v1639_v30, -inf }
 0xdc1   :  { %1646 = vmax.xlane.f32.xlu0 %v1645_v9 }
 0xdc2   :  { %v1648_v40 = vsel %vm387_vm3, %v1642_v36, -inf }
 0xdc3   :  { %1649 = vmax.xlane.f32.xlu1 %v1648_v40 }
 0xe36   :  { %v1285_v24 = vpop.xlane.xlu1 %1284 }
 0xe37   :  { %v1289_v32 = vsub.f32 %v1277_v2, %v1285_v24 }
 0xe38   :  { %v1288_v42 = vpop.xlane.xlu0 %1287 }
 0xe39   :  { %v1291_v33 = vmul.f32 1.442695, %v1289_v32  ;;  %v1290_v35 = vsub.f32 %v1280_v8, %v1288_v42 }
 0xe3b   :  { %2543 = vpow2.f32 %v1291_v33  ;;  %v1293_v44 = vmul.f32 1.442695, %v1290_v35 }
 0xe3d   :  { %2545 = vpow2.f32 %v1293_v44 }
 0xe3e   :  { %v1404_v13 = vpop.xlane.xlu0 %1403 }
 0xe3f   :  { %v1408_v47 = vsub.f32 %v1396_v12, %v1404_v13 }
 0xe40   :  { %v1407_v48 = vpop.xlane.xlu1 %1406 }
 0xe41   :  { %v1410_v43 = vmul.f32 1.442695, %v1408_v47  ;;  %v1409_v15 = vsub.f32 %v1399_v16, %v1407_v48 }
 0xe43   :  { %2547 = vpow2.f32 %v1410_v43  ;;  %v1412_v49 = vmul.f32 1.442695, %v1409_v15 }
 0xe45   :  { %v2544_v51 = vpop.eup %2543  ;;  %2549 = vpow2.f32 %v1412_v49 }
 0xe46   :  { %v1526_v53 = vpop.xlane.xlu0 %1525  ;;  %v1295_v37 = vsel %vm387_vm3, %v2544_v51, 0.0 }
 0xe47   :  { %v2546_v54 = vpop.eup %2545  ;;  %v1530_v55 = vsub.f32 %v1518_v20, %v1526_v53  ;;  %1296 = vadd.xlane.f32.xlu0 %v1295_v37 }
 0xe48   :  { %v1529_v45 = vpop.xlane.xlu1 %1528  ;;  %v1298_v46 = vsel %vm387_vm3, %v2546_v54, 0.0 }
 0xe49   :  { %v1532_v50 = vmul.f32 1.442695, %v1530_v55  ;;  %v1531_v52 = vsub.f32 %v1521_v25, %v1529_v45  ;;  %1299 = vadd.xlane.f32.xlu1 %v1298_v46  ;;  %v2481_v45 = vld [vmem:[%s3494_s8 + $0x10] sm:$0xff]  }
 0xe4a   :  { %2368 = vmatpush3.bf16.msra.mxu0 %v2481_v45 }
 0xe4b   :  { %2551 = vpow2.f32 %v1532_v50  ;;  %v1534_v56 = vmul.f32 1.442695, %v1531_v52  ;;  %2369 = vmatprep.subr.bf16.mxu0 %v2841_v31 }
 0xe4d   :  { %v2548_v41 = vpop.eup %2547  ;;  %2553 = vpow2.f32 %v1534_v56 }
 0xe4e   :  { %v1647_v57 = vpop.xlane.xlu0 %1646  ;;  %v1414_v58 = vsel %vm387_vm3, %v2548_v41, 0.0 }
 0xe4f   :  { %v2550_v59 = vpop.eup %2549  ;;  %v1651_v60 = vsub.f32 %v1639_v30, %v1647_v57  ;;  %1415 = vadd.xlane.f32.xlu0 %v1414_v58 }
 0xe50   :  { %v1417_v61 = vsel %vm387_vm3, %v2550_v59, 0.0  ;;  %v1650_v4 = vpop.xlane.xlu1 %1649 }
 0xe51   :  { %v1653_v63 = vmul.f32 1.442695, %v1651_v60  ;;  %1418 = vadd.xlane.f32.xlu1 %v1417_v61  ;;  %v1652_v7 = vsub.f32 %v1642_v36, %v1650_v4 }
 0xe53   :  { %2555 = vpow2.f32 %v1653_v63  ;;  %v1655_v12 = vmul.f32 1.442695, %v1652_v7 }
 0xe55   :  { %v2552_v2 = vpop.eup %2551  ;;  %2557 = vpow2.f32 %v1655_v12 }
 0xe56   :  { %v1536_v5 = vsel %vm387_vm3, %v2552_v2, 0.0 }
 0xe57   :  { %v2554_v6 = vpop.eup %2553  ;;  %1537 = vadd.xlane.f32.xlu0 %v1536_v5 }
 0xe58   :  { %v1539_v8 = vsel %vm387_vm3, %v2554_v6, 0.0 }
 0xe59   :  { %1540 = vadd.xlane.f32.xlu1 %v1539_v8 }
 0xe5d   :  { %v2556_v10 = vpop.eup %2555 }
 0xe5e   :  { %v1657_v11 = vsel %vm387_vm3, %v2556_v10, 0.0 }
 0xe5f   :  { %1658 = vadd.xlane.f32.xlu0 %v1657_v11  ;;  %v2558_v14 = vpop.eup %2557 }
 0xe60   :  { %v1660_v0 = vsel %vm387_vm3, %v2558_v14, 0.0 }
 0xe6a   :  { %1547 = vrot.lane.b32.xlu1 %v3314_v39, %s2847_s18 }
 0xe75   :  { %1426 = vrot.lane.b32.xlu0 %v3314_v39, %s2845_s21 }
 0xe8e   :  { %1661 = vadd.xlane.f32.xlu1 %v1660_v0 }
 0xe9f   :  { %1668 = vrot.lane.b32.xlu1 %v3314_v39, %s2848_s1 }
 0xed4   :  { %v1297_v16 = vpop.xlane.xlu0 %1296 }
 0xed5   :  { %2559 = vrcp.f32 %v1297_v16 }
 0xed6   :  { %v1300_v1 = vpop.xlane.xlu1 %1299 }
 0xed7   :  { %2561 = vrcp.f32 %v1300_v1 }
 0xedc   :  { %v1416_v19 = vpop.xlane.xlu0 %1415 }
 0xede   :  { %v1419_v17 = vpop.xlane.xlu1 %1418 }
 0xedf   :  { %v2560_v18 = vpop.eup %2559  ;;  %2563 = vrcp.f32 %v1419_v17 }
 0xee0   :  { %v1303_v21 = vmul.f32 %v2560_v18, %v2544_v51  ;;  %2565 = vrcp.f32 %v1416_v19 }
 0xee1   :  { %v2562_v20 = vpop.eup %2561 }
 0xee2   :  { %v1304_v23 = vmul.f32 %v2562_v20, %v2546_v54 }
 0xee4   :  { %v1305_v25 = vpack.c.bf16 %v1304_v23, %v1303_v21  ;;  %v1538_v39 = vpop.xlane.xlu0 %1537 }
 0xee6   :  { %v1541_v26 = vpop.xlane.xlu1 %1540  ;;  %2328 = vmatmul.mubr.msk.bf16.vlgmr.msra.gmra.mrb[24].mxu1 %vm387_vm3, %v1305_v25 }
 0xee7   :  { %2339 = vmatprep.mubr.msk.bf16.mxu1 %vm2842_vm1, %v2841_v31  ;;  %2567 = vrcp.f32 %v1541_v26 }
 0xee8   :  { %2569 = vrcp.f32 %v1538_v39 }
 0xee9   :  { %v2564_v27 = vpop.eup %2563 }
 0xeea   :  { %v2566_v29 = vpop.eup %2565  ;;  %v1423_v30 = vmul.f32 %v2564_v27, %v2550_v59  ;;  %v1548_v9 = vpop.permute.xlu1 %1547  ;;  %v2482_v59 = vld [vmem:[%s3494_s8 + $0x18] sm:$0xff]  }
 0xeeb   :  { %v1422_v22 = vmul.f32 %v2566_v29, %v2548_v41  ;;  %2370 = vmatpush3.bf16.msra.mxu0 %v2482_v59 }
 0xeec   :  { %v1659_v28 = vpop.xlane.xlu0 %1658  ;;  %2383 = vmatprep.subr.bf16.mxu0 %v2841_v31 }
 0xeed   :  { %v1424_v36 = vpack.c.bf16 %v1423_v30, %v1422_v22  ;;  %2571 = vrcp.f32 %v1659_v28 }
 0xef0   :  { %v1427_v34 = vpop.permute.xlu0 %1426 }
 0xef1   :  { %2338 = vmatpush3.bf16.msra.mxu1 %v1427_v34  ;;  %v2568_v38 = vpop.eup %2567 }
 0xef2   :  { %2349 = vmatprep.subr.bf16.mxu1 %v2841_v31  ;;  %v2570_v40 = vpop.eup %2569  ;;  %v1545_v24 = vmul.f32 %v2568_v38, %v2554_v6 }
 0xef3   :  { %v1544_v32 = vmul.f32 %v2570_v40, %v2552_v2 }
 0xef4   :  { %2340 = vmatmul.mubr.msk.bf16.vlgmr.msra.gmra.mrb[28].mxu1 %vm387_vm3, %v1424_v36  ;;  %v2484_v36 = vld [vmem:[#allocation16 + $0x18] sm:$0xff]  }
 0xef5   :  { %2350 = vmatpush3.bf16.msra.mxu1 %v1548_v9  ;;  %2351 = vmatprep.mubr.msk.bf16.mxu1 %vm2842_vm1, %v2841_v31  ;;  %v1546_v42 = vpack.c.bf16 %v1545_v24, %v1544_v32 }
 0xef6   :  { %2361 = vmatprep.subr.bf16.mxu1 %v2841_v31 }
 0xef7   :  { %v2572_v44 = vpop.eup %2571 }
 0xef8   :  { %v1665_v47 = vmul.f32 %v2572_v44, %v2556_v10  ;;  %v2163_v44 = vld [vmem:[#allocation14 + $0x1] ss:$0 sm:$0xff] }
 0xefc   :  { %2352 = vmatmul.mubr.msk.bf16.vlgmr.msra.gmra.mrb[32].mxu1 %vm387_vm3, %v1546_v42 }
 0xefd   :  { %2363 = vmatprep.mubr.msk.bf16.mxu1 %vm2842_vm1, %v2841_v31 }
 0xf1b   :  { %v1662_v33 = vpop.xlane.xlu1 %1661 }
 0xf1c   :  { %2573 = vrcp.f32 %v1662_v33 }
 0xf1f   :  { %v1669_v35 = vpop.permute.xlu1 %1668 }
 0xf20   :  { %2362 = vmatpush3.bf16.msra.mxu1 %v1669_v35 }
 0xf21   :  { %2375 = vmatprep.subr.bf16.mxu1 %v2841_v31 }
 0xf26   :  { %v2574_v13 = vpop.eup %2573 }
 0xf27   :  { %v1666_v48 = vmul.f32 %v2574_v13, %v2558_v14 }
 0xf29   :  { %v1667_v43 = vpack.c.bf16 %v1666_v48, %v1665_v47 }
 0xf2b   :  { %2364 = vmatmul.mubr.msk.bf16.vlgmr.msra.gmra.mrb[36].mxu1 %vm387_vm3, %v1667_v43 }
 0xf2c   :  { %2379 = vmatprep.mubr.msk.bf16.mxu1 %vm2842_vm1, %v2841_v31 }
 0xfb9   :  { %v1343_v15 = vpop.f32.mrb[24].mxu1 }
 0xfba   :  { %v2329_v49 = vpop.f32.mrb[25].mxu1 }
 0xfbb   :  { %v1346_v51 = vpop.f32.mrb[26].mxu1  ;;  %v2486_v49 = vld [vmem:[%s3497_s11 + $0x28] sm:$0xff]  }
 0xfbc   :  { %v2330_v53 = vpop.f32.mrb[27].mxu1 }
 0xfbd   :  { %v2488_v53 = vld [vmem:[%s3497_s11 + $0x38] sm:$0xff]  }
 0xfc7   :  { %v1466_v37 = vpop.f32.mrb[28].mxu1 }
 0xfc8   :  { %v2341_v54 = vpop.f32.mrb[29].mxu1 }
 0xfc9   :  { %v1469_v55 = vpop.f32.mrb[30].mxu1 }
 0xfca   :  { %v2446_v46 = vpack.i.bf16 %v1469_v55, %v1466_v37  ;;  %v2342_v50 = vpop.f32.mrb[31].mxu1 }
 0xfcc   :  { %2447 = vrot.lane.b32.xlu0 %v2446_v46, %s2826_s26 }
 0xfcf   :  { %v1587_v52 = vpop.f32.mrb[32].mxu1 }
 0xfd0   :  { %v2353_v56 = vpop.f32.mrb[33].mxu1 }
 0xfd1   :  { %v1590_v41 = vpop.f32.mrb[34].mxu1 }
 0xfd2   :  { %v2451_v57 = vpack.i.bf16 %v1590_v41, %v1587_v52  ;;  %v2354_v58 = vpop.f32.mrb[35].mxu1 }
 0xfd4   :  { %2452 = vrot.lane.b32.xlu1 %v2451_v57, %s2830_s24 }
 0xffe   :  { %v1708_v60 = vpop.f32.mrb[36].mxu1 }
 0xfff   :  { %v2365_v61 = vpop.f32.mrb[37].mxu1 }
0x1000   :  { %v1711_v63 = vpop.f32.mrb[38].mxu1 }
0x1001   :  { %v2456_v2 = vpack.i.bf16 %v1711_v63, %v1708_v60  ;;  %v2366_v5 = vpop.f32.mrb[39].mxu1 }
0x1003   :  { %2457 = vrot.lane.b32.xlu0 %v2456_v2, %s2849_s30 }
0x103e   :  { %v2448_v6 = vpop.permute.xlu0 %2447 }
0x103f   :  { %v2450_v10 = vunpack.i.h.bf16 %v2448_v6  ;;  %v2449_v11 = vunpack.i.l.bf16 %v2448_v6 }
0x1041   :  { %v1740_v14 = vsel %vm339_vm2, %v1346_v51, %v2450_v10  ;;  %v1739_v0 = vsel %vm339_vm2, %v1343_v15, %v2449_v11  ;;  %v2485_v15 = vld [vmem:[%s3497_s11 + $0x20] sm:$0xff]   ;;  %v2487_v51 = vld [vmem:[%s3497_s11 + $0x30] sm:$0xff]  }
0x1046   :  { %v2453_v8 = vpop.permute.xlu1 %2452 }
0x1047   :  { %v2455_v4 = vunpack.i.h.bf16 %v2453_v8  ;;  %v2454_v7 = vunpack.i.l.bf16 %v2453_v8 }
0x1049   :  { %v1742_v17 = vsel %vm387_vm3, %v1740_v14, %v2455_v4  ;;  %v1741_v18 = vsel %vm387_vm3, %v1739_v0, %v2454_v7 }
0x1075   :  { %v2458_v12 = vpop.permute.xlu0 %2457 }
0x1076   :  { %v2460_v16 = vunpack.i.h.bf16 %v2458_v12  ;;  %v2459_v1 = vunpack.i.l.bf16 %v2458_v12 }
0x1078   :  { %v1744_v19 = vsel %vm848_vm4, %v1742_v17, %v2460_v16  ;;  %v1743_v20 = vsel %vm848_vm4, %v1741_v18, %v2459_v1  ;;  %v2489_v18 = vld [vmem:[%s3499_s13] sm:$0xff]  }
0x1079   :  { %v1745_v21 = vpack.c.bf16 %v1744_v19, %v1743_v20  ;;  %v2490_v19 = vld [vmem:[%s3499_s13 + $0x8] sm:$0xff]   ;;  %s2850_s13 = smov [#allocation17]  }
0x107a   :  { %s2094_s5 = sshll.u32 %s2850_s13, 4  ;;  %s2095_s5 = int_to_ptr.vmem [resolvable:$true] %s2094_s5 }
0x107b   :  { %2372 = vmatmul.mubr.msk.bf16.vlgmr.msra.gmra.mrb[44].mxu0 %vm186_vm0, %v1745_v21  ;;  %s2789_s27 = scalar_lea.vmem %s2095_s5, 256  ;;  %p2794_p3 = scmp.lt.s32.totalorder %s2095_s5, %s2095_s5 }
0x107c   :  { %2391 = vmatprep.mubr.msk.bf16.mxu0 %vm2842_vm1, %v2841_v31  ;;  %2384 = vmatpush3.bf16.msra.mxu0 %v2485_v15  ;;  %p2790_p2 = scmp.ne.s32.totalorder %s2095_s5, %s2789_s27  ;;  %p2795_p4 = scmp.lt.s32.totalorder %s2789_s27, %s2789_s27 }
0x107d   :  { %2385 = vmatprep.subr.bf16.mxu0 %v2841_v31 }
0x107e   :  { %p2796_p5 = por %p2795_p4, %p2794_p3 }
0x1080   :  { %2386 = vmatpush3.bf16.msra.mxu0 %v2486_v49  ;;  %p2797_p6 = pnand %p2796_p5, %p2790_p2 }
0x1081   :  { %2387 = vmatprep.subr.bf16.mxu0 %v2841_v31 }
0x1084   :  { %2388 = vmatpush3.bf16.msra.mxu0 %v2487_v51 }
0x1085   :  { %2389 = vmatprep.subr.bf16.mxu0 %v2841_v31 }
0x1088   :  { %2390 = vmatpush3.bf16.msra.mxu0 %v2488_v53 }
0x114e   :  { %v1800_v23 = vpop.f32.mrb[44].mxu0 }
0x114f   :  { %v3420_v25 = vadd.f32 %v1800_v23, %v3282_v62  ;;  %v2373_v26 = vpop.f32.mrb[45].mxu0  ;;  %v2483_v62 = vld [vmem:[#allocation16 + $0x10] sm:$0xff]  }
0x1150   :  { %v1803_v39 = vpop.f32.mrb[46].mxu0  ;;  %2376 = vmatpush3.bf16.msra.mxu1 %v2483_v62 }
0x1151   :  { %v3423_v27 = vadd.f32 %v1803_v39, %v3285_v3  ;;  %v2374_v28 = vpop.f32.mrb[47].mxu0  ;;  %v1811_v29 = vmul.f32 %v3420_v25, %v3420_v25  ;;  %2377 = vmatprep.subr.bf16.mxu1 %v2841_v31 }
0x1153   :  { %v1813_v30 = vsel %vm186_vm0, %v1811_v29, 0.0  ;;  %v1812_v22 = vmul.f32 %v3423_v27, %v3423_v27 }
0x1154   :  { %1814 = vadd.xlane.f32.xlu1 %v1813_v30  ;;  %2378 = vmatpush3.bf16.msra.mxu1 %v2484_v36 }
0x1155   :  { %v1816_v34 = vsel %vm186_vm0, %v1812_v22, 0.0  ;;  %2395 = vmatprep.subr.bf16.mxu1 %v2841_v31 }
0x1156   :  { %1817 = vadd.xlane.f32.xlu0 %v1816_v34 }
0x11e1   :  { %v1815_v3 = vpop.xlane.xlu1 %1814 }
0x11e2   :  { %v1819_v38 = vmul.f32 0.03125, %v1815_v3 }
0x11e3   :  { %v1818_v9 = vpop.xlane.xlu0 %1817 }
0x11e4   :  { %v1821_v40 = vadd.f32 1e-06, %v1819_v38  ;;  %v1820_v24 = vmul.f32 0.03125, %v1818_v9 }
0x11e6   :  { %2575 = vrsqrt.f32 %v1821_v40  ;;  %v1822_v32 = vadd.f32 1e-06, %v1820_v24 }
0x11e8   :  { %2577 = vrsqrt.f32 %v1822_v32 }
0x11f0   :  { %v2576_v42 = vpop.eup %2575 }
0x11f1   :  { %v1825_v33 = vmul.f32 %v2576_v42, %v3420_v25 }
0x11f2   :  { %v2578_v35 = vpop.eup %2577 }
0x11f3   :  { %v1826_v13 = vmul.f32 %v2578_v35, %v3423_v27  ;;  %v1833_v47 = vmul.f32 %v2163_v44, %v1825_v33 }
0x11f5   :  { %v1834_v48 = vmul.f32 %v2163_v44, %v1826_v13 }
0x11f7   :  { %v1835_v43 = vpack.c.bf16 %v1834_v48, %v1833_v47 }
0x11f9   :  { %2380 = vmatmul.mubr.msk.bf16.vlgmr.msra.gmra.mrb[40].mxu1 %vm186_vm0, %v1835_v43 }
0x11fa   :  { %2399 = vmatprep.mubr.msk.bf16.mxu1 %vm2842_vm1, %v2841_v31  ;;  %2396 = vmatpush3.bf16.msra.mxu1 %v2489_v18 }
0x11fb   :  { %2397 = vmatprep.subr.bf16.mxu1 %v2841_v31  ;;  %v2182_v31 = vld [vmem:[%s3498_s12] ss:$0 sm:$0xff] }
0x11fe   :  { %2398 = vmatpush3.bf16.msra.mxu1 %v2490_v19 }
0x12cc   :  { %v1890_v37 = vpop.f32.mrb[40].mxu1 }
0x12cd   :  { %1913 = vrot.lane.b32.xlu0 %v1890_v37, %s2836_s6  ;;  %v2381_v54 = vpop.f32.mrb[41].mxu1  ;;  %v2167_v46 = vmul.f32 -1.442695, %v1890_v37 }
0x12ce   :  { %v1893_v55 = vpop.f32.mrb[42].mxu1 }
0x12cf   :  { %1915 = vrot.lane.b32.xlu1 %v1893_v55, %s2836_s6  ;;  %v2382_v45 = vpop.f32.mrb[43].mxu1  ;;  %v2168_v50 = vmul.f32 -1.442695, %v1893_v55  ;;  %2579 = vpow2.f32 %v2167_v46 }
0x12d1   :  { %2581 = vpow2.f32 %v2168_v50 }
0x12d9   :  { %v2580_v52 = vpop.eup %2579 }
0x12da   :  { %v1903_v41 = vadd.f32 1.0, %v2580_v52 }
0x12db   :  { %v2582_v56 = vpop.eup %2581 }
0x12dc   :  { %v1904_v57 = vadd.f32 1.0, %v2582_v56  ;;  %2583 = vrcp.f32 %v1903_v41 }
0x12de   :  { %2585 = vrcp.f32 %v1904_v57 }
0x12e6   :  { %v2584_v58 = vpop.eup %2583 }
0x12e7   :  { %v1909_v61 = vmul.f32 %v2584_v58, %v1890_v37 }
0x12e8   :  { %v2586_v59 = vpop.eup %2585 }
0x12e9   :  { %v1910_v63 = vmul.f32 %v2586_v59, %v1893_v55 }
0x133f   :  { %v1914_v60 = vpop.permute.xlu0 %1913 }
0x1340   :  { %v1919_v5 = vmul.f32 %v1914_v60, %v1909_v61 }
0x1341   :  { %v1916_v2 = vpop.permute.xlu1 %1915 }
0x1342   :  { %v1920_v6 = vmul.f32 %v1916_v2, %v1910_v63 }
0x1344   :  { %v1921_v8 = vpack.c.bf16 %v1920_v6, %v1919_v5 }
0x1346   :  { %2392 = vmatmul.mubr.msk.bf16.vlgmr.msra.gmra.mrb[48].mxu0 %vm1057_vm5, %v1921_v8 }
0x1419   :  { %v1992_v10 = vpop.f32.mrb[48].mxu0 }
0x141a   :  { %v1999_v11 = vadd.f32 %v1992_v10, %v3420_v25  ;;  %v2393_v4 = vpop.f32.mrb[49].mxu0 }
0x141b   :  { %v1995_v7 = vpop.f32.mrb[50].mxu0 }
0x141c   :  { %v2000_v12 = vadd.f32 %v1995_v7, %v3423_v27  ;;  %v2394_v14 = vpop.f32.mrb[51].mxu0  ;;  %v2002_v0 = vmul.f32 %v1999_v11, %v1999_v11 }
0x141e   :  { %v2004_v16 = vsel %vm186_vm0, %v2002_v0, 0.0  ;;  %v2003_v1 = vmul.f32 %v2000_v12, %v2000_v12 }
0x141f   :  { %2005 = vadd.xlane.f32.xlu1 %v2004_v16 }
0x1420   :  { %v2007_v17 = vsel %vm186_vm0, %v2003_v1, 0.0 }
0x1421   :  { %2008 = vadd.xlane.f32.xlu0 %v2007_v17 }
0x14ac   :  { %v2006_v20 = vpop.xlane.xlu1 %2005 }
0x14ad   :  { %v2010_v21 = vmul.f32 0.03125, %v2006_v20 }
0x14ae   :  { %v2009_v23 = vpop.xlane.xlu0 %2008 }
0x14af   :  { %v2012_v25 = vadd.f32 1e-06, %v2010_v21  ;;  %v2011_v26 = vmul.f32 0.03125, %v2009_v23 }
0x14b1   :  { %2587 = vrsqrt.f32 %v2012_v25  ;;  %v2013_v39 = vadd.f32 1e-06, %v2011_v26 }
0x14b3   :  { %2589 = vrsqrt.f32 %v2013_v39 }
0x14bb   :  { %v2588_v27 = vpop.eup %2587 }
0x14bc   :  { %v2016_v28 = vmul.f32 %v2588_v27, %v1999_v11 }
0x14bd   :  { %v2590_v29 = vpop.eup %2589 }
0x14be   :  { %v2017_v30 = vmul.f32 %v2590_v29, %v2000_v12  ;;  %v2024_v22 = vmul.f32 %v2182_v31, %v2016_v28 }
0x14c0   :  { %v2025_v34 = vmul.f32 %v2182_v31, %v2017_v30 }
0x14c2   :  { %v2026_v62 = vpack.c.bf16 %v2025_v34, %v2024_v22 }
0x14c4   :  { %2400 = vmatmul.mubr.msk.bf16.vlgmr.msra.gmra.mrb[44].mxu1 %vm186_vm0, %v2026_v62 }
0x1597   :  { %v2080_v36 = vpop.f32.mrb[44].mxu1 }
0x1598   :  { %2087 = vst [vmem:[#allocation17] sm:$0xff] %v2080_v36  ;;  %v2401_v3 = vpop.f32.mrb[45].mxu1 }
0x1599   :  { %v2083_v38 = vpop.f32.mrb[46].mxu1 }
0x159a   :  { %2088 = vst [vmem:[#allocation17 + $0x8] sm:$0xff] %v2083_v38  ;;  %v2402_v9 = vpop.f32.mrb[47].mxu1 }
0x159b   :  { %2800 = shalt.err (!%p2797_p6)
}
0x159c   :  { %s2801_s19 = scalar_lea.hbm %s3500_s14, 256 }
0x159d   :  { %p2802_p7 = scmp.ne.s32.totalorder %s3500_s14, %s2801_s19  ;;  %p2805_p8 = scmp.lt.u32.totalorder %s2801_s19, %s3500_s14 }
0x159f   :  { %p2807_p9 = pnand %p2805_p8, %p2802_p7 }
0x15a1   :  { %2810 = shalt.err (!%p2807_p9)
}
0x15a2   :  { %2100 = dma.vmem_to_hbm [thread:$0]  %s2095_s5, 256, %s3500_s14, [#allocation4], %s2825_s25, %s2825_s25, %s2826_s26  }
0x15a3   :  { %2821 = dma.done.wait [#allocation4], 256  }
0x15a4   :  { %2822 = vsyncadd [#allocation4], 4294967040 }
0x15a5   :  { %2104 = vsyncpa [#allocation3], 1 }
0x15a6   :  { %2105 = vsyncpa [#allocation6], 1 }
0x15a7   :  { %2106 = vsyncpa [#allocation9], 1 }
0x15a8   :  { %2107 = vsyncpa [#allocation12], 1 }
0x15a9   :  { %2108 = vsyncpa [#allocation15], 1 }
0x15aa   :  { %2109 = vsyncpa [#allocation4], 1 }

</bundles_post_ra>
